<compile_context>
chip_gen: v5e
topology: v5e:2x2
jax: 0.10.0
libtpu: 0.0.40
codegen_flags: <defaults>
</compile_context>

<pallas_src>
import functools

import jax
import jax.numpy as jnp
import numpy as np
from jax.experimental import pallas as pl
from jax.experimental.pallas import tpu as pltpu


def _attention_kernel(x_ref, wcomb_ref, bias_ref, masks_ref, temp_ref, bmask_ref,
                      wproj_ref, bproj_ref, o_ref, *, H, W, Nb):
    f32 = jnp.float32
    C = x_ref.shape[1]          # dim
    HW = H * W
    L = Nb * HW                 # lane extent of this grid step (Nb images side by side)

    # ---- gather the Nb images of this step side by side along the lane axis ----
    if Nb == 1:
        xcat = x_ref[0].astype(f32)                                   # (C, L)
    else:
        xcat = jnp.concatenate([x_ref[b].astype(f32) for b in range(Nb)], axis=1)

    masks = masks_ref[...]                                            # (9, L)

    # ---- fused 1x1 conv + 3x3 depthwise conv as ONE MXU matmul ------------------
    # Each depthwise tap is a lane rotation of x (XLU) gated by a precomputed
    # boundary mask; image-to-image / circular wraparound lands only on masked
    # positions.  Contraction dim of the single matmul is 9*C.
    slabs = []
    for ky in range(3):
        for kx in range(3):
            t = ky * 3 + kx
            off = (ky - 1) * W + (kx - 1)
            if off == 0:
                slabs.append(xcat)                                    # centre tap
            else:
                rolled = pltpu.roll(xcat, shift=(-off) % L, axis=1)
                slabs.append(rolled * masks[t:t + 1, :])
    x_stack = jnp.concatenate(slabs, axis=0)                          # (9C, L)

    # bias_ref already carries dw-bias + qkv-bias pushed through the taps.
    qkv = jnp.dot(wcomb_ref[...], x_stack, preferred_element_type=f32) + bias_ref[...]

    q_all = qkv[0:C]                                                  # (C, L)
    k_all = qkv[C:2 * C]
    v_all = qkv[2 * C:3 * C]

    temp = temp_ref[...]                                              # (C, 1)
    bmask = bmask_ref[...]                                            # (C, C), 0 / -1e30

    # ---- per-image channel attention (heads merged into full-C matmuls) --------
    outs = []
    for b in range(Nb):
        sl = slice(b * HW, (b + 1) * HW)
        q = q_all[:, sl]
        k = k_all[:, sl]
        v = v_all[:, sl]

        # L2-normalize along the spatial axis (rsqrt on the EUP, no divides).
        qn = q * jax.lax.rsqrt(jnp.maximum(jnp.sum(q * q, -1, keepdims=True), 1e-24))
        kn = k * jax.lax.rsqrt(jnp.maximum(jnp.sum(k * k, -1, keepdims=True), 1e-24))

        # ONE (C, C) logits matmul for all heads; the block-diagonal -1e30 mask
        # makes the full-row softmax exactly equal the per-head softmax.
        logits = jax.lax.dot_general(qn, kn, (((1,), (1,)), ((), ())),
                                     preferred_element_type=f32)
        logits = logits * temp + bmask
        logits = logits - jnp.max(logits, axis=-1, keepdims=True)
        e = jnp.exp(logits)
        attn = e * pl.reciprocal(jnp.sum(e, axis=-1, keepdims=True), approx=False)

        outs.append(jnp.dot(attn, v, preferred_element_type=f32))     # (C, HW)

    out_all = outs[0] if Nb == 1 else jnp.concatenate(outs, axis=1)   # (C, L)

    # ---- single fused 1x1 output projection for all heads / all images ---------
    proj = jnp.dot(wproj_ref[...], out_all, preferred_element_type=f32) + bproj_ref[...]

    for b in range(Nb):
        o_ref[b] = proj[:, b * HW:(b + 1) * HW].astype(o_ref.dtype)


def attention_forward(x, params, num_heads, batch_block=None):
    """Attention.forward.  x: (N, dim, H, W) NCHW, params in PyTorch layouts."""
    N, C, H, W = x.shape
    HW = H * W
    ch = C // num_heads

    # Images per grid step: keep the grid length >= 2 (feeds both v7x TensorCores),
    # batch 2 images per step when there is enough batch to amortize step overhead.
    if batch_block is None:
        batch_block = 2 if (N >= 4 and N % 2 == 0) else 1
    Nb = batch_block
    assert N % Nb == 0
    G = N // Nb
    L = Nb * HW

    f32 = jnp.float32
    wqkv = params["qkv_w"].reshape(3 * C, C).astype(f32)
    bqkv = params["qkv_b"].reshape(3 * C, 1).astype(f32)
    wdw = params["dw_w"].reshape(3 * C, 9).astype(f32)
    bdw = params["dw_b"].reshape(3 * C, 1).astype(f32)
    wproj = params["proj_w"].reshape(C, C).astype(f32)
    bproj = params["proj_b"].reshape(C, 1).astype(f32)
    temp = jnp.repeat(params["temperature"].reshape(num_heads), ch).reshape(C, 1).astype(f32)

    # Combined (depthwise-3x3 ∘ 1x1) weight, tap-major columns:
    # w_comb[o, t*C + i] = wdw[o, t] * wqkv[o, i]
    w_comb = (wdw[:, :, None] * wqkv[:, None, :]).reshape(3 * C, 9 * C)

    # Per-tap in-bounds masks of the row-flattened (unpadded) image.
    yy = np.arange(HW) // W
    xx = np.arange(HW) % W
    m = np.zeros((9, HW), np.float32)
    for ky in range(3):
        for kx in range(3):
            sy, sx = yy + ky - 1, xx + kx - 1
            m[ky * 3 + kx] = ((sy >= 0) & (sy < H) & (sx >= 0) & (sx < W)).astype(np.float32)
    masks = jnp.asarray(np.tile(m, (1, Nb)))                           # (9, L)

    # Additive bias map: depthwise bias + qkv bias pushed through the 9 taps
    # (zero where the tap's source pixel is the zero-padding ring).
    bias_map = bdw + bqkv * (wdw @ jnp.asarray(m))                     # (3C, HW)
    bias_map = jnp.tile(bias_map, (1, Nb))                             # (3C, L)

    # Block-diagonal additive softmax mask (0 within a head, -1e30 across heads).
    hid = np.repeat(np.arange(num_heads), ch)
    bmask = jnp.asarray(np.where(hid[:, None] == hid[None, :], 0.0, -1e30).astype(np.float32))

    # x as (N, C, H*W): a free view of NCHW, no padding / no post-slice.
    x2 = x.reshape(N, C, HW)

    # Conservative VMEM budget (explicit so production sizes stay within v7x's 64 MiB).
    est = 4 * (2 * 2 * Nb * C * HW                     # double-buffered in/out blocks
               + 3 * C * 9 * C + 3 * C * L + 9 * L + 2 * C * C + 2 * C   # resident params
               + 9 * C * L + 3 * C * L + 8 * C * L)    # main intermediates
    vmem_limit = int(min(max(4 * est, 32 * 2 ** 20), 48 * 2 ** 20))

    kernel = functools.partial(_attention_kernel, H=H, W=W, Nb=Nb)

    out = pl.pallas_call(
        kernel,
        out_shape=jax.ShapeDtypeStruct((N, C, HW), x.dtype),
        grid=(G,),
        in_specs=[
            pl.BlockSpec((Nb, C, HW), lambda g: (g, 0, 0)),    # x: Nb images / step
            pl.BlockSpec((3 * C, 9 * C), lambda g: (0, 0)),    # combined conv weight (resident)
            pl.BlockSpec((3 * C, L), lambda g: (0, 0)),        # additive bias map
            pl.BlockSpec((9, L), lambda g: (0, 0)),            # per-tap boundary masks
            pl.BlockSpec((C, 1), lambda g: (0, 0)),            # per-channel temperature
            pl.BlockSpec((C, C), lambda g: (0, 0)),            # block-diagonal softmax mask
            pl.BlockSpec((C, C), lambda g: (0, 0)),            # projection weight
            pl.BlockSpec((C, 1), lambda g: (0, 0)),            # projection bias
        ],
        out_specs=pl.BlockSpec((Nb, C, HW), lambda g: (g, 0, 0)),
        compiler_params=pltpu.CompilerParams(
            dimension_semantics=("parallel",),
            vmem_limit_bytes=vmem_limit),
    )(x2, w_comb, bias_map, masks, temp, bmask, wproj, bproj)

    return out.reshape(N, C, H, W)


def _attention_ref(x, params, num_heads):
    """Pure-JAX/XLA reference with the exact PyTorch semantics."""
    N, C, H, W = x.shape
    hp = jax.lax.Precision.HIGHEST
    dn = ("NCHW", "OIHW", "NCHW")

    qkv = jax.lax.conv_general_dilated(x, params["qkv_w"], (1, 1), "VALID",
                                       dimension_numbers=dn, precision=hp)
    qkv = qkv + params["qkv_b"].reshape(1, 3 * C, 1, 1)
    qkv = jax.lax.conv_general_dilated(qkv, params["dw_w"], (1, 1), ((1, 1), (1, 1)),
                                       dimension_numbers=dn,
                                       feature_group_count=3 * C, precision=hp)
    qkv = qkv + params["dw_b"].reshape(1, 3 * C, 1, 1)

    q, k, v = jnp.split(qkv, 3, axis=1)

    def to_heads(t):
        return t.reshape(N, num_heads, C // num_heads, H * W)

    q, k, v = to_heads(q), to_heads(k), to_heads(v)
    q = q / jnp.maximum(jnp.linalg.norm(q, axis=-1, keepdims=True), 1e-12)
    k = k / jnp.maximum(jnp.linalg.norm(k, axis=-1, keepdims=True), 1e-12)

    attn = jnp.einsum("bhcd,bhkd->bhck", q, k, precision=hp)
    attn = attn * params["temperature"].reshape(1, num_heads, 1, 1)
    attn = jax.nn.softmax(attn, axis=-1)
    out = jnp.einsum("bhck,bhkd->bhcd", attn, v, precision=hp)
    out = out.reshape(N, C, H, W)
    out = jax.lax.conv_general_dilated(out, params["proj_w"], (1, 1), "VALID",
                                       dimension_numbers=dn, precision=hp)
    return out + params["proj_b"].reshape(1, C, 1, 1)


if __name__ == "__main__":
    dim, num_heads = 32, 4
    H, W = 16, 16

    key = jax.random.PRNGKey(0)
    ks = jax.random.split(key, 9)
    params = {
        "qkv_w": 0.1 * jax.random.normal(ks[1], (3 * dim, dim, 1, 1), jnp.float32),
        "qkv_b": 0.1 * jax.random.normal(ks[2], (3 * dim,), jnp.float32),
        "dw_w": 0.2 * jax.random.normal(ks[3], (3 * dim, 1, 3, 3), jnp.float32),
        "dw_b": 0.1 * jax.random.normal(ks[4], (3 * dim,), jnp.float32),
        "temperature": 1.0 + 0.1 * jax.random.normal(ks[5], (num_heads, 1, 1), jnp.float32),
        "proj_w": 0.1 * jax.random.normal(ks[6], (dim, dim, 1, 1), jnp.float32),
        "proj_b": 0.1 * jax.random.normal(ks[7], (dim,), jnp.float32),
    }

    # Primary check: batch 2 -> one image per grid step (2 parallel steps).
    x = jax.random.normal(ks[0], (2, dim, H, W), jnp.float32)
    out = jax.block_until_ready(attention_forward(x, params, num_heads))
    ref = jax.block_until_ready(_attention_ref(x, params, num_heads))
    assert out.shape == x.shape
    np.testing.assert_allclose(np.asarray(out), np.asarray(ref), rtol=5e-4, atol=5e-4)

    # Secondary check: batch 4 exercises the 2-images-per-grid-step (wide-lane) path.
    x4 = jax.random.normal(ks[8], (4, dim, H, W), jnp.float32)
    out4 = jax.block_until_ready(attention_forward(x4, params, num_heads))
    ref4 = jax.block_until_ready(_attention_ref(x4, params, num_heads))
    np.testing.assert_allclose(np.asarray(out4), np.asarray(ref4), rtol=5e-4, atol=5e-4)

    print("KERNEL_OK")
</pallas_src>

<mosaic_0001>
module attributes {stable_mosaic.version = 11 : i64} {
  func.func @_attention_kernel(%arg0: i32, %arg1: memref<1x32x256xf32, #tpu.memory_space<vmem>>, %arg2: memref<96x288xf32, #tpu.memory_space<vmem>>, %arg3: memref<96x256xf32, #tpu.memory_space<vmem>>, %arg4: memref<9x256xf32, #tpu.memory_space<vmem>>, %arg5: memref<32x1xf32, #tpu.memory_space<vmem>>, %arg6: memref<32x32xf32, #tpu.memory_space<vmem>>, %arg7: memref<32x32xf32, #tpu.memory_space<vmem>>, %arg8: memref<32x1xf32, #tpu.memory_space<vmem>>, %arg9: memref<1x32x256xf32, #tpu.memory_space<vmem>>) attributes {dimension_semantics = [#tpu.dimension_semantics<parallel>], iteration_bounds = array<i64: 2>, scalar_prefetch = 0 : i64, scratch_operands = 0 : i64, tpu.core_type = #tpu.core_type<tc>, window_params = [{transform_indices = @transform_0, window_bounds = array<i64: 1, 32, 256>}, {pipeline_mode = #tpu.pipeline_mode<synchronous>, transform_indices = @transform_1, window_bounds = array<i64: 96, 288>}, {pipeline_mode = #tpu.pipeline_mode<synchronous>, transform_indices = @transform_2, window_bounds = array<i64: 96, 256>}, {pipeline_mode = #tpu.pipeline_mode<synchronous>, transform_indices = @transform_3, window_bounds = array<i64: 9, 256>}, {pipeline_mode = #tpu.pipeline_mode<synchronous>, transform_indices = @transform_4, window_bounds = array<i64: 32, 1>}, {pipeline_mode = #tpu.pipeline_mode<synchronous>, transform_indices = @transform_5, window_bounds = array<i64: 32, 32>}, {pipeline_mode = #tpu.pipeline_mode<synchronous>, transform_indices = @transform_6, window_bounds = array<i64: 32, 32>}, {pipeline_mode = #tpu.pipeline_mode<synchronous>, transform_indices = @transform_7, window_bounds = array<i64: 32, 1>}, {transform_indices = @transform_8, window_bounds = array<i64: 1, 32, 256>}]} {
    %c0 = arith.constant 0 : index
    %c0_0 = arith.constant 0 : index
    %c0_1 = arith.constant 0 : index
    %0 = vector.load %arg1[%c0, %c0_0, %c0_1] : memref<1x32x256xf32, #tpu.memory_space<vmem>>, vector<1x32x256xf32>
    %1 = vector.shape_cast %0 : vector<1x32x256xf32> to vector<32x256xf32>
    %c0_2 = arith.constant 0 : index
    %c0_3 = arith.constant 0 : index
    %2 = vector.load %arg4[%c0_2, %c0_3] : memref<9x256xf32, #tpu.memory_space<vmem>>, vector<9x256xf32>
    %c17_i32 = arith.constant 17 : i32
    %3 = tpu.dynamic_rotate %1 by %c17_i32 dim 1 : vector<32x256xf32>, i32 -> vector<32x256xf32>
    %4 = vector.extract_strided_slice %2 {offsets = [0, 0], sizes = [1, 256], strides = [1, 1]} : vector<9x256xf32> to vector<1x256xf32>
    %5 = vector.broadcast %4 : vector<1x256xf32> to vector<32x256xf32>
    %6 = arith.mulf %3, %5 : vector<32x256xf32>
    %c16_i32 = arith.constant 16 : i32
    %7 = tpu.dynamic_rotate %1 by %c16_i32 dim 1 : vector<32x256xf32>, i32 -> vector<32x256xf32>
    %8 = vector.extract_strided_slice %2 {offsets = [1, 0], sizes = [1, 256], strides = [1, 1]} : vector<9x256xf32> to vector<1x256xf32>
    %9 = vector.broadcast %8 : vector<1x256xf32> to vector<32x256xf32>
    %10 = arith.mulf %7, %9 : vector<32x256xf32>
    %c15_i32 = arith.constant 15 : i32
    %11 = tpu.dynamic_rotate %1 by %c15_i32 dim 1 : vector<32x256xf32>, i32 -> vector<32x256xf32>
    %12 = vector.extract_strided_slice %2 {offsets = [2, 0], sizes = [1, 256], strides = [1, 1]} : vector<9x256xf32> to vector<1x256xf32>
    %13 = vector.broadcast %12 : vector<1x256xf32> to vector<32x256xf32>
    %14 = arith.mulf %11, %13 : vector<32x256xf32>
    %c1_i32 = arith.constant 1 : i32
    %15 = tpu.dynamic_rotate %1 by %c1_i32 dim 1 : vector<32x256xf32>, i32 -> vector<32x256xf32>
    %16 = vector.extract_strided_slice %2 {offsets = [3, 0], sizes = [1, 256], strides = [1, 1]} : vector<9x256xf32> to vector<1x256xf32>
    %17 = vector.broadcast %16 : vector<1x256xf32> to vector<32x256xf32>
    %18 = arith.mulf %15, %17 : vector<32x256xf32>
    %c255_i32 = arith.constant 255 : i32
    %19 = tpu.dynamic_rotate %1 by %c255_i32 dim 1 : vector<32x256xf32>, i32 -> vector<32x256xf32>
    %20 = vector.extract_strided_slice %2 {offsets = [5, 0], sizes = [1, 256], strides = [1, 1]} : vector<9x256xf32> to vector<1x256xf32>
    %21 = vector.broadcast %20 : vector<1x256xf32> to vector<32x256xf32>
    %22 = arith.mulf %19, %21 : vector<32x256xf32>
    %c241_i32 = arith.constant 241 : i32
    %23 = tpu.dynamic_rotate %1 by %c241_i32 dim 1 : vector<32x256xf32>, i32 -> vector<32x256xf32>
    %24 = vector.extract_strided_slice %2 {offsets = [6, 0], sizes = [1, 256], strides = [1, 1]} : vector<9x256xf32> to vector<1x256xf32>
    %25 = vector.broadcast %24 : vector<1x256xf32> to vector<32x256xf32>
    %26 = arith.mulf %23, %25 : vector<32x256xf32>
    %c240_i32 = arith.constant 240 : i32
    %27 = tpu.dynamic_rotate %1 by %c240_i32 dim 1 : vector<32x256xf32>, i32 -> vector<32x256xf32>
    %28 = vector.extract_strided_slice %2 {offsets = [7, 0], sizes = [1, 256], strides = [1, 1]} : vector<9x256xf32> to vector<1x256xf32>
    %29 = vector.broadcast %28 : vector<1x256xf32> to vector<32x256xf32>
    %30 = arith.mulf %27, %29 : vector<32x256xf32>
    %c239_i32 = arith.constant 239 : i32
    %31 = tpu.dynamic_rotate %1 by %c239_i32 dim 1 : vector<32x256xf32>, i32 -> vector<32x256xf32>
    %32 = vector.extract_strided_slice %2 {offsets = [8, 0], sizes = [1, 256], strides = [1, 1]} : vector<9x256xf32> to vector<1x256xf32>
    %33 = vector.broadcast %32 : vector<1x256xf32> to vector<32x256xf32>
    %34 = arith.mulf %31, %33 : vector<32x256xf32>
    %35 = tpu.concatenate %6, %10, %14, %18, %1, %22, %26, %30, %34 in 0 : vector<32x256xf32>, vector<32x256xf32>, vector<32x256xf32>, vector<32x256xf32>, vector<32x256xf32>, vector<32x256xf32>, vector<32x256xf32>, vector<32x256xf32>, vector<32x256xf32> -> vector<288x256xf32>
    %c0_4 = arith.constant 0 : index
    %c0_5 = arith.constant 0 : index
    %36 = vector.load %arg2[%c0_4, %c0_5] : memref<96x288xf32, #tpu.memory_space<vmem>>, vector<96x288xf32>
    %cst = arith.constant dense<0.000000e+00> : vector<96x256xf32>
    %37 = tpu.matmul %36, %35, %cst {dimension_numbers = #tpu.dot_dimension_numbers<[1], [0], [0], [1], [0, 0, 1, 1], [], []>} : vector<96x288xf32>, vector<288x256xf32>, vector<96x256xf32> -> vector<96x256xf32>
    %c0_6 = arith.constant 0 : index
    %c0_7 = arith.constant 0 : index
    %38 = vector.load %arg3[%c0_6, %c0_7] : memref<96x256xf32, #tpu.memory_space<vmem>>, vector<96x256xf32>
    %39 = arith.addf %37, %38 : vector<96x256xf32>
    %40 = vector.extract_strided_slice %39 {offsets = [0, 0], sizes = [32, 256], strides = [1, 1]} : vector<96x256xf32> to vector<32x256xf32>
    %41 = vector.extract_strided_slice %39 {offsets = [32, 0], sizes = [32, 256], strides = [1, 1]} : vector<96x256xf32> to vector<32x256xf32>
    %42 = vector.extract_strided_slice %39 {offsets = [64, 0], sizes = [32, 256], strides = [1, 1]} : vector<96x256xf32> to vector<32x256xf32>
    %c0_8 = arith.constant 0 : index
    %c0_9 = arith.constant 0 : index
    %43 = vector.load %arg5[%c0_8, %c0_9] : memref<32x1xf32, #tpu.memory_space<vmem>>, vector<32x1xf32>
    %c0_10 = arith.constant 0 : index
    %c0_11 = arith.constant 0 : index
    %44 = vector.load %arg6[%c0_10, %c0_11] : memref<32x32xf32, #tpu.memory_space<vmem>>, vector<32x32xf32>
    %45 = arith.mulf %40, %40 : vector<32x256xf32>
    %cst_12 = arith.constant dense<0.000000e+00> : vector<32xf32>
    %46 = vector.multi_reduction <add>, %45, %cst_12 [1] : vector<32x256xf32> to vector<32xf32>
    %47 = vector.shape_cast %46 : vector<32xf32> to vector<32x1xf32>
    %cst_13 = arith.constant 1.000000e-24 : f32
    %48 = vector.broadcast %cst_13 : f32 to vector<32x1xf32>
    %49 = arith.maximumf %47, %48 : vector<32x1xf32>
    %50 = math.rsqrt %49 : vector<32x1xf32>
    %51 = vector.broadcast %50 : vector<32x1xf32> to vector<32x256xf32>
    %52 = arith.mulf %40, %51 : vector<32x256xf32>
    %53 = arith.mulf %41, %41 : vector<32x256xf32>
    %cst_14 = arith.constant dense<0.000000e+00> : vector<32xf32>
    %54 = vector.multi_reduction <add>, %53, %cst_14 [1] : vector<32x256xf32> to vector<32xf32>
    %55 = vector.shape_cast %54 : vector<32xf32> to vector<32x1xf32>
    %cst_15 = arith.constant 1.000000e-24 : f32
    %56 = vector.broadcast %cst_15 : f32 to vector<32x1xf32>
    %57 = arith.maximumf %55, %56 : vector<32x1xf32>
    %58 = math.rsqrt %57 : vector<32x1xf32>
    %59 = vector.broadcast %58 : vector<32x1xf32> to vector<32x256xf32>
    %60 = arith.mulf %41, %59 : vector<32x256xf32>
    %cst_16 = arith.constant dense<0.000000e+00> : vector<32x32xf32>
    %61 = tpu.matmul %52, %60, %cst_16 {dimension_numbers = #tpu.dot_dimension_numbers<[1], [1], [0], [0], [0, 0, 1, 0], [], []>} : vector<32x256xf32>, vector<32x256xf32>, vector<32x32xf32> -> vector<32x32xf32>
    %62 = vector.broadcast %43 : vector<32x1xf32> to vector<32x32xf32>
    %63 = arith.mulf %61, %62 : vector<32x32xf32>
    %64 = arith.addf %63, %44 : vector<32x32xf32>
    %cst_17 = arith.constant dense<0xFF800000> : vector<32xf32>
    %65 = vector.multi_reduction <maximumf>, %64, %cst_17 [1] : vector<32x32xf32> to vector<32xf32>
    %66 = vector.shape_cast %65 : vector<32xf32> to vector<32x1xf32>
    %67 = vector.broadcast %66 : vector<32x1xf32> to vector<32x32xf32>
    %68 = arith.subf %64, %67 : vector<32x32xf32>
    %69 = math.exp %68 : vector<32x32xf32>
    %cst_18 = arith.constant dense<0.000000e+00> : vector<32xf32>
    %70 = vector.multi_reduction <add>, %69, %cst_18 [1] : vector<32x32xf32> to vector<32xf32>
    %71 = vector.shape_cast %70 : vector<32xf32> to vector<32x1xf32>
    %72 = tpu.reciprocal %71 : vector<32x1xf32> -> vector<32x1xf32>
    %73 = vector.broadcast %72 : vector<32x1xf32> to vector<32x32xf32>
    %74 = arith.mulf %69, %73 : vector<32x32xf32>
    %cst_19 = arith.constant dense<0.000000e+00> : vector<32x256xf32>
    %75 = tpu.matmul %74, %42, %cst_19 {dimension_numbers = #tpu.dot_dimension_numbers<[1], [0], [0], [1], [0, 0, 1, 1], [], []>} : vector<32x32xf32>, vector<32x256xf32>, vector<32x256xf32> -> vector<32x256xf32>
    %c0_20 = arith.constant 0 : index
    %c0_21 = arith.constant 0 : index
    %76 = vector.load %arg7[%c0_20, %c0_21] : memref<32x32xf32, #tpu.memory_space<vmem>>, vector<32x32xf32>
    %cst_22 = arith.constant dense<0.000000e+00> : vector<32x256xf32>
    %77 = tpu.matmul %76, %75, %cst_22 {dimension_numbers = #tpu.dot_dimension_numbers<[1], [0], [0], [1], [0, 0, 1, 1], [], []>} : vector<32x32xf32>, vector<32x256xf32>, vector<32x256xf32> -> vector<32x256xf32>
    %c0_23 = arith.constant 0 : index
    %c0_24 = arith.constant 0 : index
    %78 = vector.load %arg8[%c0_23, %c0_24] : memref<32x1xf32, #tpu.memory_space<vmem>>, vector<32x1xf32>
    %79 = vector.broadcast %78 : vector<32x1xf32> to vector<32x256xf32>
    %80 = arith.addf %77, %79 : vector<32x256xf32>
    %c0_25 = arith.constant 0 : index
    %c0_26 = arith.constant 0 : index
    %c0_27 = arith.constant 0 : index
    %81 = vector.load %arg9[%c0_25, %c0_26, %c0_27] : memref<1x32x256xf32, #tpu.memory_space<vmem>>, vector<1x32x256xf32>
    %82 = vector.shape_cast %81 : vector<1x32x256xf32> to vector<32x256xf32>
    %83 = vector.shape_cast %80 : vector<32x256xf32> to vector<1x32x256xf32>
    tpu.vector_store %arg9[%c0_25, %c0_26, %c0_27], %83 {strides = array<i32>} : memref<1x32x256xf32, #tpu.memory_space<vmem>>, vector<1x32x256xf32>,
    return
  }
  func.func @transform_0(%arg0: i32) -> (i32, i32, i32) {
    %c0_i32 = arith.constant 0 : i32
    %c0_i32_0 = arith.constant 0 : i32
    %c0_i32_1 = arith.constant 0 : i32
    return %arg0, %c0_i32, %c0_i32_0 : i32, i32, i32
  }
  func.func @transform_1(%arg0: i32) -> (i32, i32) {
    %c0_i32 = arith.constant 0 : i32
    %c0_i32_0 = arith.constant 0 : i32
    %c0_i32_1 = arith.constant 0 : i32
    return %c0_i32, %c0_i32_0 : i32, i32
  }
  func.func @transform_2(%arg0: i32) -> (i32, i32) {
    %c0_i32 = arith.constant 0 : i32
    %c0_i32_0 = arith.constant 0 : i32
    %c0_i32_1 = arith.constant 0 : i32
    return %c0_i32, %c0_i32_0 : i32, i32
  }
  func.func @transform_3(%arg0: i32) -> (i32, i32) {
    %c0_i32 = arith.constant 0 : i32
    %c0_i32_0 = arith.constant 0 : i32
    %c0_i32_1 = arith.constant 0 : i32
    return %c0_i32, %c0_i32_0 : i32, i32
  }
  func.func @transform_4(%arg0: i32) -> (i32, i32) {
    %c0_i32 = arith.constant 0 : i32
    %c0_i32_0 = arith.constant 0 : i32
    %c0_i32_1 = arith.constant 0 : i32
    return %c0_i32, %c0_i32_0 : i32, i32
  }
  func.func @transform_5(%arg0: i32) -> (i32, i32) {
    %c0_i32 = arith.constant 0 : i32
    %c0_i32_0 = arith.constant 0 : i32
    %c0_i32_1 = arith.constant 0 : i32
    return %c0_i32, %c0_i32_0 : i32, i32
  }
  func.func @transform_6(%arg0: i32) -> (i32, i32) {
    %c0_i32 = arith.constant 0 : i32
    %c0_i32_0 = arith.constant 0 : i32
    %c0_i32_1 = arith.constant 0 : i32
    return %c0_i32, %c0_i32_0 : i32, i32
  }
  func.func @transform_7(%arg0: i32) -> (i32, i32) {
    %c0_i32 = arith.constant 0 : i32
    %c0_i32_0 = arith.constant 0 : i32
    %c0_i32_1 = arith.constant 0 : i32
    return %c0_i32, %c0_i32_0 : i32, i32
  }
  func.func @transform_8(%arg0: i32) -> (i32, i32, i32) {
    %c0_i32 = arith.constant 0 : i32
    %c0_i32_0 = arith.constant 0 : i32
    %c0_i32_1 = arith.constant 0 : i32
    return %arg0, %c0_i32, %c0_i32_0 : i32, i32, i32
  }
}

</mosaic_0001>

<bundles_post_ra>
// kernel: tpu_custom_call.1
= control target key start
LH: loop header
LB: loop body
LE: loop exit
PB: predicated region body
PF: predicated region fallthrough
CT: control target
= control target key end

     0   :  { %s3054_s0 = inlined_call_operand.hbm [shape: f32[2,32,256], index: 0, kind: input, shape index: {}]   ;;  %s3055_s1 = inlined_call_operand.hbm [shape: f32[96,288], index: 1, kind: input, shape index: {}]   ;;  %s3056_s2 = inlined_call_operand.hbm [shape: f32[96,256], index: 2, kind: input, shape index: {}]   ;;  %s3057_s3 = inlined_call_operand.vmem [shape: f32[9,256], index: 3, kind: input, shape index: {}]   ;;  %s3058_s4 = inlined_call_operand.vmem [shape: f32[32,1], index: 4, kind: input, shape index: {}]   ;;  %s3059_s5 = inlined_call_operand.vmem [shape: f32[32,32], index: 5, kind: input, shape index: {}]   ;;  %s3060_s6 = inlined_call_operand.hbm [shape: f32[32,32], index: 6, kind: input, shape index: {}]   ;;  %s3061_s7 = inlined_call_operand.vmem [shape: f32[32,1], index: 7, kind: input, shape index: {}]   ;;  %s3062_s8 = inlined_call_operand.hbm [shape: f32[2,32,256], index: 8, kind: output, shape index: {}]  }
   0x1   :  { %3065 = sst [smem:[#allocation15_spill]] %s3055_s1 }
   0x2   :  { %3066 = sst [smem:[#allocation16_spill]] %s3056_s2 }
   0x3   :  { %13 = vsyncpa [#allocation3], 0 }
   0x4   :  { %15 = vsyncpa [#allocation3 + $0x1], 0 }
   0x5   :  { %16 = vsyncpa [#allocation6], 0 }
   0x6   :  { %17 = vsyncpa [#allocation9], 0 }
   0x7   :  { %18 = vsyncpa [#allocation4], 0 }
   0x8   :  { %20 = vsyncpa [#allocation4 + $0x1], 0  ;;  %s2165_s27 = smov 0   ;;  %s2167_s28 = smov 0  }
   0x9   :  { %s2169_s29 = smov 0   ;;  %s2171_s30 = smov 0  }
   0xa LB: > { %s2186_s9 = sadd.s32 4294967295, %s2099_s30   ;;  %s1713_s10 = sadd.s32 4294967294, %s2099_s30   ;;  %s2099_s30 = sphi %s2171_s30, %s3081_s30   ;;  %s2095_s29 = sphi %s2169_s29, %s3080_s29   ;;  %s2091_s28 = sphi %s2167_s28, %s3079_s28   ;;  %s2087_s27 = sphi %s2165_s27, %s3078_s27  }
   0xb   : > { %p46_p0 = scmp.ne.s32.totalorder %s2091_s28, %s2087_s27  ;;  %p47_p1 = scmp.eq.s32.totalorder %s2186_s9, 0 }
   0xc   : > { %p217_p2 = scmp.eq.s32.totalorder %s2186_s9, 1  ;;  %p223_p3 = scmp.eq.s32.totalorder %s1713_s10, 1 }
   0xd   : > { %p2195_p4 = por %p47_p1, %p46_p0  ;;  %p1714_p5 = scmp.ge.s32.totalorder %s2099_s30, 1 }
   0xe   : > { %p2200_p6 = por %p223_p3, %p46_p0  ;;  %p230_p7 = scmp.lt.s32.totalorder %s2099_s30, 3 }
   0xf   : > { %s3069_s1 = sld [smem:[#allocation15_spill]]  ;;  %s2101_s17 = smov [#allocation5]  }
  0x10   : > { %p2208_p8 = pnand %p1714_p5, %p230_p7  ;;  %s243_s18 = sshll.u32 %s2101_s17, 4  ;;  %s244_s18 = int_to_ptr.vmem [resolvable:$true] %s243_s18 }
  0x11   : > { %s3072_s2 = sld [smem:[#allocation16_spill]]  ;;  %s2102_s23 = smov 384  }
  0x12   : > { %p1791_p9 = pneg %p2208_p8  ;;  %s2103_s24 = smov 24  }
  0x13   : > { %s2104_s25 = smov [#allocation7]   ;;  %s3063_s10 = smov 256  }
  0x14   : > { %p2216_p10 = pnand %p1791_p9, %p47_p1  ;;  %s257_s26 = sshll.u32 %s2104_s25, 4  ;;  %s258_s26 = int_to_ptr.vmem [resolvable:$true] %s257_s26 }
  0x15   : > { %s241_s15 = sshll.u32 %s3069_s1, 4  ;;  %s3064_s13 = smov 16   ;;  %s242_s15 = int_to_ptr.hbm [resolvable:$true] %s241_s15 }
  0x16   : > { %1794 = dma.hbm_to_vmem [thread:$0]  (!%p2216_p10), %s242_s15, 4608, %s244_s18, [#allocation6], %s2102_s23, %s2102_s23, %s2103_s24  }
  0x17   : > { %s255_s22 = sshll.u32 %s3072_s2, 4  ;;  %s278_s15 = sshll.u32 %s3060_s6, 4  ;;  %s256_s22 = int_to_ptr.hbm [resolvable:$true] %s255_s22  ;;  %s279_s15 = int_to_ptr.hbm [resolvable:$true] %s278_s15 }
  0x18   : > { %1797 = dma.hbm_to_vmem [thread:$0]  (!%p2216_p10), %s256_s22, 3072, %s258_s26, [#allocation6], %s3063_s10, %s3063_s10, %s3064_s13  }
  0x19   : > { %s2107_s18 = smov [#allocation8]   ;;  %s2108_s21 = smov 128  }
  0x1a   : > { %s280_s20 = sshll.u32 %s2107_s18, 4  ;;  %s2109_s23 = smov 8   ;;  %s281_s20 = int_to_ptr.vmem [resolvable:$true] %s280_s20 }
  0x1b   : > { %1800 = dma.hbm_to_vmem [thread:$0]  (!%p2216_p10), %s279_s15, 512, %s281_s20, [#allocation9], %s2108_s21, %s2108_s21, %s2109_s23  }
  0x1c   : > { %s2237_s24 = sadd.s32 1, %s2099_s30   ;;  %s33_s25 = sadd.s32 1, %s2095_s29 }
  0x1d   : > { %s30_s22 = ssub.s32 %s2099_s30, %s2237_s24  ;;  %p40_p13 = scmp.ne.s32.totalorder %s2095_s29, %s2091_s28 }
  0x1e   : > { %p31_p12 = scmp.eq.s32.totalorder %s30_s22, 0  ;;  %p41_p0 = scmp.eq.s32.totalorder %s2099_s30, 0 }
  0x1f   : > { %p2250_p3 = por %p217_p2, %p40_p13  ;;  %p1812_p5 = scmp.lt.s32.totalorder %s2099_s30, 2 }
  0x20   : > { %s2246_s26 = scalar_select %p31_p12, %s2095_s29, %s33_s25  }
  0x21   : > { %s297_s17 = sand.u32 1, %s2095_s29   ;;  %s1773_s18 = sshll.u32 %s2099_s30, 6 }
  0x22   : > { %p42_p7 = por %p41_p0, %p40_p13  ;;  %s1719_s19 = sshll.u32 %s297_s17, 6 }
  0x23   : > { %s306_s21 = scalar_lea.hbm %s3054_s0, %s1773_s18  ;;  %s301_s22 = scalar_lea.vmem [#allocation2], %s1719_s19 }
  0x24   : > { %s307_s23 = sshll.u32 %s306_s21, 4  ;;  %s309_s10 = sshll.u32 %s301_s22, 4  ;;  %s308_s23 = int_to_ptr.hbm [resolvable:$true] %s307_s23  ;;  %s310_s10 = int_to_ptr.vmem [resolvable:$true] %s309_s10 }
  0x25   : > { %p2260_p9 = pnand %p1812_p5, %p42_p7  ;;  %s298_s13 = scalar_lea.sflag [#allocation3], %s297_s17 }
  0x26   : > { %s1995_s1 = sshra.s32 %s308_s23, 4  ;;  %s2002_s19 = scalar_lea.hbm %s3054_s0, 128  ;;  %s1996_s1 = int_to_ptr.hbm [resolvable:$true] %s1995_s1 }
  0x27   : > { %s1997_s2 = scalar_lea.hbm %s1996_s1, 64  ;;  %p1999_p10 = pneg %p2260_p9 }
  0x28   : > { %p1998_p2 = scmp.ne.s32.totalorder %s1996_s1, %s1997_s2  ;;  %p2003_p0 = scmp.lt.s32.totalorder %s1996_s1, %s3054_s0 }
  0x29   : > { %p2004_p5 = scmp.lt.s32.totalorder %s2002_s19, %s1997_s2 }
  0x2a   : > { %p2000_p12 = pnand %p1999_p10, %p1998_p2 }
  0x2b   : > { %p2005_p7 = por %p2004_p5, %p2003_p0 }
  0x2c   : > { %p2001_p13 = pneg %p2000_p12 }
  0x2e   : > { %p2006_p11 = pnand %p2005_p7, %p2001_p13 }
  0x30   : > { %2009 = shalt.err (!%p2006_p11)
}
  0x31   : > { %s3075_s17 = smov 16   ;;  %s3076_s22 = smov 256  }
  0x32   : > { %1804 = dma.hbm_to_vmem [thread:$0]  (!%p2260_p9), %s308_s23, 1024, %s310_s10, %s298_s13, %s3076_s22, %s3076_s22, %s3075_s17  }
  0x33   : > { %321 = sbr.rel (%p2208_p8) target bundleno = 1449 (0x5a9), region = 52  ;;  %s2280_s18 = sand.u32 (!%p2208_p8), 1, %s2091_s28  }
  0x34   : > { %s1723_s1 = sshll.u32 (!%p2208_p8), %s2280_s18, 6  ;;  %s324_s2 = scalar_lea.sflag (!%p2208_p8), [#allocation3], %s2280_s18 }
  0x35   : > { %s327_s15 = scalar_lea.vmem (!%p2208_p8), [#allocation2], %s1723_s1 }
  0x38   : > { %2070 = dma.done.wait (%p2195_p4), %s324_s2, 1024  }
  0x39   : > { %2072 = vsyncadd (%p2195_p4), %s324_s2, 4294966272 }
  0x3a   : > { %2074 = dma.done.wait (%p47_p1), [#allocation6], 7680  }
  0x3b   : > { %2076 = vsyncadd (%p47_p1), [#allocation6], 4294959616 }
  0x3c   : > { %2078 = dma.done.wait (%p47_p1), [#allocation9], 512  }
  0x3d   : > { %2080 = vsyncadd (%p47_p1), [#allocation9], 4294966784  ;;  %v2298_v0 = vld [vmem:[%s327_s15 + $0x30] sm:$0xff]  ;;  %v2300_v1 = vld [vmem:[%s327_s15 + $0x20] sm:$0xff]  ;;  %s2110_s16 = smov 1   ;;  %s2111_s11 = smov 15   ;;  %v404_v11 = vlaneseq }
  0x3e   : > { %501 = vrot.lane.b32.xlu0 %v2298_v0, %s2110_s16  ;;  %499 = vrot.lane.b32.xlu1 %v2300_v1, %s2110_s16  ;;  %v2304_v2 = vld [vmem:[%s327_s15 + $0x10] sm:$0xff]  ;;  %v2307_v3 = vld [vmem:[%s327_s15 + $0x38] sm:$0xff]  ;;  %s2112_s10 = smov 16   ;;  %s2113_s13 = smov 111   ;;  %vm730_vm4 = vcmask 261120  }
  0x3f   : > { %497 = vrot.lane.b32.xlu2 %v2304_v2, %s2110_s16  ;;  %v2309_v4 = vld [vmem:[%s327_s15 + $0x28] sm:$0xff]  ;;  %v2311_v5 = vld [vmem:[%s327_s15 + $0x18] sm:$0xff]  ;;  %v2318_v7 = vld [vmem:[%s327_s15] sm:$0xff]  ;;  %s2114_s23 = smov 17   ;;  %s2115_s25 = smov 112   ;;  %v2367_v14 = vand.u32 127, %v404_v11 }
  0x40   : > { %v2316_v6 = vld [vmem:[%s327_s15 + $0x8] sm:$0xff]  ;;  %v2372_v16 = vld [vmem:[%s3057_s3] sm:$0xff]  ;;  %s2116_s22 = smov 113   ;;  %s2117_s2 = smov 127  }
  0x41   : > { %v2377_v17 = vld [vmem:[%s3057_s3 + $0x8] sm:$0xff]  ;;  %vm511_vm0 = vcmp.lt.s32.totalorder %v2367_v14, 1  ;;  %v520_v18 = vperm.slane %v2372_v16, 3  ;;  %vm476_vm1 = vcmp.lt.s32.totalorder %v2367_v14, 15  ;;  %v485_v42 = vperm.slane %v2372_v16, 2 }
  0x42   : > { %v521_v19 = vperm.slane %v2377_v17, 3  ;;  %v486_v43 = vperm.slane %v2377_v17, 2  ;;  %vm441_vm2 = vcmp.lt.s32.totalorder %v2367_v14, 16  ;;  %v450_v62 = vperm.slane %v2372_v16, 1 }
  0x43   : > { %v451_v63 = vperm.slane %v2377_v17, 1  ;;  %vm651_vm3 = vcmp.lt.s32.totalorder %v2367_v14, 111  ;;  %vm406_vm5 = vcmp.lt.s32.totalorder %v2367_v14, 17  ;;  %vm616_vm6 = vcmp.lt.s32.totalorder %v2367_v14, 112 }
  0x44   : > { %vm581_vm7 = vcmp.lt.s32.totalorder %v2367_v14, 113  ;;  %vm546_vm8 = vcmp.lt.s32.totalorder %v2367_v14, 127  ;;  %v697_v14 = vld [vmem:[#allocation5 + $0xd8] sm:$0xff] }
  0x46   : > { %509 = vrot.lane.b32.xlu0 %v2307_v3, %s2110_s16  ;;  %507 = vrot.lane.b32.xlu1 %v2309_v4, %s2110_s16 }
  0x47   : > { %505 = vrot.lane.b32.xlu2 %v2311_v5, %s2110_s16 }
  0x4e   : > { %503 = vrot.lane.b32.xlu1 %v2316_v6, %s2110_s16  ;;  %495 = vrot.lane.b32.xlu0 %v2318_v7, %s2110_s16 }
  0x4f   : > { %466 = vrot.lane.b32.xlu2 %v2298_v0, %s2111_s11 }
  0x56   : > { %464 = vrot.lane.b32.xlu1 %v2300_v1, %s2111_s11  ;;  %474 = vrot.lane.b32.xlu0 %v2307_v3, %s2111_s11 }
  0x57   : > { %472 = vrot.lane.b32.xlu2 %v2309_v4, %s2111_s11 }
  0x5e   : > { %470 = vrot.lane.b32.xlu1 %v2311_v5, %s2111_s11  ;;  %462 = vrot.lane.b32.xlu0 %v2304_v2, %s2111_s11 }
  0x5f   : > { %460 = vrot.lane.b32.xlu2 %v2318_v7, %s2111_s11 }
  0x66   : > { %431 = vrot.lane.b32.xlu1 %v2298_v0, %s2112_s10  ;;  %468 = vrot.lane.b32.xlu0 %v2316_v6, %s2111_s11  ;;  %s2045_s11 = scalar_lea.hbm %s3062_s8, 128 }
  0x67   : > { %439 = vrot.lane.b32.xlu2 %v2307_v3, %s2112_s10 }
  0x6e   : > { %649 = vrot.lane.b32.xlu1 %v2307_v3, %s2113_s13  ;;  %641 = vrot.lane.b32.xlu0 %v2298_v0, %s2113_s13 }
  0x6f   : > { %429 = vrot.lane.b32.xlu2 %v2300_v1, %s2112_s10 }
  0x76   : > { %639 = vrot.lane.b32.xlu1 %v2300_v1, %s2113_s13  ;;  %437 = vrot.lane.b32.xlu0 %v2309_v4, %s2112_s10 }
  0x77   : > { %647 = vrot.lane.b32.xlu2 %v2309_v4, %s2113_s13 }
  0x7e   : > { %435 = vrot.lane.b32.xlu1 %v2311_v5, %s2112_s10  ;;  %427 = vrot.lane.b32.xlu0 %v2304_v2, %s2112_s10 }
  0x7f   : > { %637 = vrot.lane.b32.xlu2 %v2304_v2, %s2113_s13 }
  0x86   : > { %425 = vrot.lane.b32.xlu1 %v2318_v7, %s2112_s10  ;;  %645 = vrot.lane.b32.xlu0 %v2311_v5, %s2113_s13 }
  0x87   : > { %433 = vrot.lane.b32.xlu2 %v2316_v6, %s2112_s10 }
  0x8e   : > { %643 = vrot.lane.b32.xlu1 %v2316_v6, %s2113_s13  ;;  %635 = vrot.lane.b32.xlu0 %v2318_v7, %s2113_s13 }
  0x8f   : > { %394 = vrot.lane.b32.xlu2 %v2298_v0, %s2114_s23 }
  0x96   : > { %392 = vrot.lane.b32.xlu1 %v2300_v1, %s2114_s23  ;;  %402 = vrot.lane.b32.xlu0 %v2307_v3, %s2114_s23 }
  0x97   : > { %400 = vrot.lane.b32.xlu2 %v2309_v4, %s2114_s23 }
  0x99   : > { %v498_v8 = vpop.permute.xlu2 %497 }
  0x9e   : > { %398 = vrot.lane.b32.xlu1 %v2311_v5, %s2114_s23  ;;  %390 = vrot.lane.b32.xlu0 %v2304_v2, %s2114_s23 }
  0x9f   : > { %388 = vrot.lane.b32.xlu2 %v2318_v7, %s2114_s23 }
  0xa1   : > { %v506_v9 = vpop.permute.xlu2 %505 }
  0xa2   : > { %v513_v29 = vsel %vm511_vm0, %v498_v8, %v506_v9  ;;  %v517_v30 = vsel %vm511_vm0, %v506_v9, %v498_v8 }
  0xa3   : > { %v524_v33 = vmul.f32 %v520_v18, %v517_v30  ;;  %v525_v34 = vmul.f32 %v521_v19, %v513_v29 }
  0xa6   : > { %396 = vrot.lane.b32.xlu0 %v2316_v6, %s2114_s23  ;;  %606 = vrot.lane.b32.xlu1 %v2298_v0, %s2115_s25  ;;  %s3009_s23 = scalar_lea.vmem [#allocation10], %s1723_s1  ;;  %s1774_s1 = sshll.u32 %s2186_s9, 6 }
  0xa7   : > { %614 = vrot.lane.b32.xlu2 %v2307_v3, %s2115_s25  ;;  %s1607_s20 = scalar_lea.hbm %s3062_s8, %s1774_s1  ;;  %s1608_s21 = sshll.u32 %s3009_s23, 4  ;;  %s1609_s21 = int_to_ptr.vmem [resolvable:$true] %s1608_s21 }
  0xa8   : > { %s1610_s17 = sshll.u32 %s1607_s20, 4  ;;  %s1611_s17 = int_to_ptr.hbm [resolvable:$true] %s1610_s17 }
  0xa9   : > { %v467_v10 = vpop.permute.xlu2 %466 }
  0xae   : > { %604 = vrot.lane.b32.xlu0 %v2300_v1, %s2115_s25  ;;  %612 = vrot.lane.b32.xlu1 %v2309_v4, %s2115_s25 }
  0xaf   : > { %602 = vrot.lane.b32.xlu2 %v2304_v2, %s2115_s25 }
  0xb0   : > { %v502_v12 = vpop.permute.xlu0 %501  ;;  %v500_v13 = vpop.permute.xlu1 %499 }
  0xb1   : > { %v473_v15 = vpop.permute.xlu2 %472 }
  0xb6   : > { %610 = vrot.lane.b32.xlu0 %v2311_v5, %s2115_s25  ;;  %600 = vrot.lane.b32.xlu1 %v2318_v7, %s2115_s25 }
  0xb7   : > { %608 = vrot.lane.b32.xlu2 %v2316_v6, %s2115_s25 }
  0xb8   : > { %v510_v20 = vpop.permute.xlu0 %509  ;;  %v508_v21 = vpop.permute.xlu1 %507 }
  0xb9   : > { %v514_v22 = vsel %vm511_vm0, %v500_v13, %v508_v21  ;;  %v518_v23 = vsel %vm511_vm0, %v508_v21, %v500_v13  ;;  %v519_v24 = vsel %vm511_vm0, %v510_v20, %v502_v12  ;;  %v515_v25 = vsel %vm511_vm0, %v502_v12, %v510_v20  ;;  %v2393_v28 = vpop.permute.xlu2 %460 }
  0xba   : > { %v528_v26 = vmul.f32 %v520_v18, %v519_v24  ;;  %v529_v27 = vmul.f32 %v521_v19, %v515_v25  ;;  %v526_v31 = vmul.f32 %v520_v18, %v518_v23  ;;  %v527_v32 = vmul.f32 %v521_v19, %v514_v22  ;;  %v1871_v22 = vld [vmem:[%s3057_s3 + $0x10] ss:$0 sm:$0xff] }
  0xbc   : > { %767 = vmatpush.msra.mxu0 %v528_v26  ;;  %926 = vmatpush.msra.mxu3 %v529_v27 }
  0xbe   : > { %768 = vmatpush.msra.mxu0 %v526_v31  ;;  %927 = vmatpush.msra.mxu3 %v527_v32 }
  0xbf   : > { %571 = vrot.lane.b32.xlu0 %v2298_v0, %s2116_s22  ;;  %579 = vrot.lane.b32.xlu1 %v2307_v3, %s2116_s22 }
  0xc0   : > { %769 = vmatpush.msra.mxu0 %v524_v33  ;;  %928 = vmatpush.msra.mxu3 %v525_v34  ;;  %v504_v35 = vpop.permute.xlu1 %503  ;;  %v496_v36 = vpop.permute.xlu0 %495 }
  0xc1   : > { %v512_v37 = vsel %vm511_vm0, %v496_v36, %v504_v35  ;;  %v516_v38 = vsel %vm511_vm0, %v504_v35, %v496_v36  ;;  %569 = vrot.lane.b32.xlu2 %v2300_v1, %s2116_s22  ;;  %v440_v41 = vpop.permute.xlu2 %439 }
  0xc2   : > { %v522_v39 = vmul.f32 %v520_v18, %v516_v38  ;;  %v523_v40 = vmul.f32 %v521_v19, %v512_v37 }
  0xc4   : > { %770 = vmatpush.msra.mxu0 %v522_v39  ;;  %929 = vmatpush.msra.mxu3 %v523_v40 }
  0xc7   : > { %577 = vrot.lane.b32.xlu0 %v2309_v4, %s2116_s22  ;;  %567 = vrot.lane.b32.xlu1 %v2304_v2, %s2116_s22 }
  0xc8   : > { %v465_v44 = vpop.permute.xlu1 %464  ;;  %v475_v45 = vpop.permute.xlu0 %474 }
  0xc9   : > { %v480_v46 = vsel %vm476_vm1, %v467_v10, %v475_v45  ;;  %v484_v47 = vsel %vm476_vm1, %v475_v45, %v467_v10  ;;  %v479_v48 = vsel %vm476_vm1, %v465_v44, %v473_v15  ;;  %v483_v49 = vsel %vm476_vm1, %v473_v15, %v465_v44  ;;  %575 = vrot.lane.b32.xlu2 %v2311_v5, %s2116_s22  ;;  %v430_v54 = vpop.permute.xlu2 %429 }
  0xca   : > { %v493_v50 = vmul.f32 %v485_v42, %v484_v47  ;;  %v494_v51 = vmul.f32 %v486_v43, %v480_v46  ;;  %v491_v52 = vmul.f32 %v485_v42, %v483_v49  ;;  %v492_v53 = vmul.f32 %v486_v43, %v479_v48 }
  0xcc   : > { %771 = vmatpush.msra.mxu0 %v493_v50  ;;  %930 = vmatpush.msra.mxu3 %v494_v51 }
  0xce   : > { %772 = vmatpush.msra.mxu0 %v491_v52  ;;  %931 = vmatpush.msra.mxu3 %v492_v53 }
  0xcf   : > { %565 = vrot.lane.b32.xlu0 %v2318_v7, %s2116_s22  ;;  %573 = vrot.lane.b32.xlu1 %v2316_v6, %s2116_s22  ;;  %s1596_s22 = scalar_lea.sflag [#allocation4], %s2280_s18 }
  0xd0   : > { %v471_v55 = vpop.permute.xlu1 %470  ;;  %v463_v56 = vpop.permute.xlu0 %462 }
  0xd1   : > { %v478_v57 = vsel %vm476_vm1, %v463_v56, %v471_v55  ;;  %v482_v58 = vsel %vm476_vm1, %v471_v55, %v463_v56  ;;  %536 = vrot.lane.b32.xlu2 %v2298_v0, %s2117_s2  ;;  %v2436_v61 = vpop.permute.xlu2 %647 }
  0xd2   : > { %v489_v59 = vmul.f32 %v485_v42, %v482_v58  ;;  %v490_v60 = vmul.f32 %v486_v43, %v478_v57  ;;  %v2511_v57 = vld [vmem:[#allocation5 + $0x10] sm:$0xff]  ;;  %v415_v58 = vperm.slane %v2372_v16, 0 }
  0xd4   : > { %773 = vmatpush.msra.mxu0 %v489_v59  ;;  %932 = vmatpush.msra.mxu3 %v490_v60  ;;  %v416_v59 = vperm.slane %v2377_v17, 0 }
  0xd7   : > { %544 = vrot.lane.b32.xlu0 %v2307_v3, %s2117_s2  ;;  %534 = vrot.lane.b32.xlu1 %v2300_v1, %s2117_s2 }
  0xd8   : > { %v432_v8 = vpop.permute.xlu1 %431  ;;  %v469_v9 = vpop.permute.xlu0 %468 }
  0xd9   : > { %v477_v10 = vsel %vm476_vm1, %v2393_v28, %v469_v9  ;;  %v481_v11 = vsel %vm476_vm1, %v469_v9, %v2393_v28  ;;  %v445_v12 = vsel %vm441_vm2, %v432_v8, %v440_v41  ;;  %v449_v13 = vsel %vm441_vm2, %v440_v41, %v432_v8  ;;  %542 = vrot.lane.b32.xlu2 %v2309_v4, %s2117_s2  ;;  %v2457_v21 = vpop.permute.xlu2 %637 }
  0xda   : > { %v487_v15 = vmul.f32 %v485_v42, %v481_v11  ;;  %v488_v18 = vmul.f32 %v486_v43, %v477_v10  ;;  %v458_v19 = vmul.f32 %v450_v62, %v449_v13  ;;  %v459_v20 = vmul.f32 %v451_v63, %v445_v12 }
  0xdc   : > { %774 = vmatpush.msra.mxu0 %v487_v15  ;;  %933 = vmatpush.msra.mxu3 %v488_v18  ;;  %v2526_v18 = vld [vmem:[#allocation5 + $0x28] sm:$0xff] }
  0xde   : > { %775 = vmatpush.msra.mxu0 %v458_v19  ;;  %934 = vmatpush.msra.mxu3 %v459_v20 }
  0xdf   : > { %532 = vrot.lane.b32.xlu0 %v2304_v2, %s2117_s2  ;;  %540 = vrot.lane.b32.xlu1 %v2311_v5, %s2117_s2 }
  0xe0   : > { %v2467_v23 = vpop.permute.xlu1 %649  ;;  %v2469_v24 = vpop.permute.xlu0 %641 }
  0xe1   : > { %v655_v25 = vsel %vm651_vm3, %v2469_v24, %v2467_v23  ;;  %530 = vrot.lane.b32.xlu2 %v2318_v7, %s2117_s2  ;;  %v434_v27 = vpop.permute.xlu2 %433 }
  0xe2   : > { %v668_v26 = vmul.f32 %v1871_v22, %v655_v25 }
  0xe4   : > { %885 = vmatpush.msra.mxu2 %v668_v26 }
  0xe7   : > { %538 = vrot.lane.b32.xlu0 %v2316_v6, %s2117_s2  ;;  %s2039_s2 = sshra.s32 %s1611_s17, 4  ;;  %s2040_s2 = int_to_ptr.hbm [resolvable:$true] %s2039_s2 }
  0xe8   : > { %v2479_v28 = vpop.permute.xlu1 %639  ;;  %v438_v29 = vpop.permute.xlu0 %437  ;;  %s2041_s15 = scalar_lea.hbm %s2040_s2, 64  ;;  %p2046_p11 = scmp.lt.s32.totalorder %s2040_s2, %s3062_s8 }
  0xe9   : > { %v444_v30 = vsel %vm441_vm2, %v430_v54, %v438_v29  ;;  %v448_v31 = vsel %vm441_vm2, %v438_v29, %v430_v54  ;;  %v654_v32 = vsel %vm651_vm3, %v2479_v28, %v2436_v61  ;;  %v395_v36 = vpop.permute.xlu2 %394  ;;  %p2042_p1 = scmp.ne.s32.totalorder %s2040_s2, %s2041_s15  ;;  %p2047_p9 = scmp.lt.s32.totalorder %s2045_s11, %s2041_s15 }
  0xea   : > { %v456_v33 = vmul.f32 %v450_v62, %v448_v31  ;;  %v457_v34 = vmul.f32 %v451_v63, %v444_v30  ;;  %v666_v35 = vmul.f32 %v1871_v22, %v654_v32  ;;  %v2534_v30 = vld [vmem:[#allocation5 + $0x40] sm:$0xff]  ;;  %v625_v32 = vperm.slane %v2372_v16, 7 }
  0xeb   : > { %p2043_p4 = pnand %p2042_p1, %p2250_p3  ;;  %p2048_p2 = por %p2047_p9, %p2046_p11 }
  0xec   : > { %776 = vmatpush.msra.mxu0 %v456_v33  ;;  %935 = vmatpush.msra.mxu3 %v457_v34  ;;  %v626_v33 = vperm.slane %v2377_v17, 7  ;;  %v659_v34 = vsel %vm651_vm3, %v2467_v23, %v2469_v24  ;;  %v670_v24 = vld [vmem:[#allocation5] sm:$0xff] }
  0xed   : > { %886 = vmatpush.msra.mxu2 %v666_v35  ;;  %p2044_p8 = pneg %p2043_p4 }
  0xef   : > { %p2049_p10 = pnand %p2048_p2, %p2044_p8 }
  0xf0   : > { %v436_v37 = vpop.permute.xlu1 %435  ;;  %v428_v38 = vpop.permute.xlu0 %427 }
  0xf1   : > { %v443_v39 = vsel %vm441_vm2, %v428_v38, %v436_v37  ;;  %v447_v40 = vsel %vm441_vm2, %v436_v37, %v428_v38  ;;  %v401_v48 = vpop.permute.xlu2 %400 }
  0xf2   : > { %v454_v41 = vmul.f32 %v450_v62, %v447_v40  ;;  %v455_v42 = vmul.f32 %v451_v63, %v443_v39 }
  0xf4   : > { %777 = vmatpush.msra.mxu0 %v454_v41  ;;  %936 = vmatpush.msra.mxu3 %v455_v42 }
  0xf8   : > { %v426_v43 = vpop.permute.xlu1 %425  ;;  %v2493_v44 = vpop.permute.xlu0 %645 }
  0xf9   : > { %v653_v45 = vsel %vm651_vm3, %v2457_v21, %v2493_v44  ;;  %v442_v46 = vsel %vm441_vm2, %v426_v43, %v434_v27  ;;  %v446_v47 = vsel %vm441_vm2, %v434_v27, %v426_v43  ;;  %v389_v55 = vpop.permute.xlu2 %388  ;;  %v2556_v43 = vld [vmem:[#allocation5 + $0x58] sm:$0xff] }
  0xfa   : > { %v664_v49 = vmul.f32 %v1871_v22, %v653_v45  ;;  %v452_v50 = vmul.f32 %v450_v62, %v446_v47  ;;  %v453_v51 = vmul.f32 %v451_v63, %v442_v46  ;;  %v658_v46 = vsel %vm651_vm3, %v2436_v61, %v2479_v28 }
  0xfc   : > { %887 = vmatpush.msra.mxu2 %v664_v49  ;;  %778 = vmatpush.msra.mxu0 %v452_v50  ;;  %v657_v49 = vsel %vm651_vm3, %v2493_v44, %v2457_v21 }
  0xfd   : > { %937 = vmatpush.msra.mxu3 %v453_v51 }
 0x100   : > { %v2503_v52 = vpop.permute.xlu1 %643  ;;  %v2505_v53 = vpop.permute.xlu0 %635 }
 0x101   : > { %v652_v54 = vsel %vm651_vm3, %v2505_v53, %v2503_v52  ;;  %v615_v19 = vpop.permute.xlu2 %614  ;;  %v656_v61 = vsel %vm651_vm3, %v2503_v52, %v2505_v53 }
 0x102   : > { %v662_v56 = vmul.f32 %v1871_v22, %v652_v54 }
 0x104   : > { %888 = vmatpush.msra.mxu2 %v662_v56 }
 0x105   : > { %1728 = vmatmul.msk.f32.vlgmr.msra.gmra.mxu2 %vm730_vm4, %v2511_v57 }
 0x108   : > { %v393_v60 = vpop.permute.xlu1 %392  ;;  %v403_v62 = vpop.permute.xlu0 %402 }
 0x109   : > { %v410_v63 = vsel %vm406_vm5, %v395_v36, %v403_v62  ;;  %v414_v8 = vsel %vm406_vm5, %v403_v62, %v395_v36  ;;  %v409_v9 = vsel %vm406_vm5, %v393_v60, %v401_v48  ;;  %v413_v10 = vsel %vm406_vm5, %v401_v48, %v393_v60  ;;  %v603_v31 = vpop.permute.xlu2 %602  ;;  %v1872_v36 = vld [vmem:[%s3057_s3 + $0x18] ss:$0 sm:$0xff]  ;;  %v2576_v62 = vld [vmem:[#allocation5 + $0x70] sm:$0xff] }
 0x10a   : > { %v423_v11 = vmul.f32 %v415_v58, %v414_v8  ;;  %v424_v12 = vmul.f32 %v416_v59, %v410_v63  ;;  %v421_v13 = vmul.f32 %v415_v58, %v413_v10  ;;  %v422_v15 = vmul.f32 %v416_v59, %v409_v9 }
 0x10b   : > { %v669_v48 = vmul.f32 %v1872_v36, %v659_v34  ;;  %v667_v50 = vmul.f32 %v1872_v36, %v658_v46  ;;  %v665_v54 = vmul.f32 %v1872_v36, %v657_v49  ;;  %v663_v56 = vmul.f32 %v1872_v36, %v656_v61 }
 0x10c   : > { %779 = vmatpush.msra.mxu0 %v423_v11  ;;  %938 = vmatpush.msra.mxu3 %v424_v12  ;;  %v676_v11 = vld [vmem:[#allocation5 + $0x30] sm:$0xff] }
 0x10d   : > { %1729 = vmatmul.msk.f32.gmra.mxu2 %vm730_vm4, %v2526_v18 }
 0x10e   : > { %780 = vmatpush.msra.mxu0 %v421_v13  ;;  %939 = vmatpush.msra.mxu3 %v422_v15 }
 0x110   : > { %v399_v20 = vpop.permute.xlu1 %398  ;;  %v391_v22 = vpop.permute.xlu0 %390 }
 0x111   : > { %v408_v25 = vsel %vm406_vm5, %v391_v22, %v399_v20  ;;  %v412_v26 = vsel %vm406_vm5, %v399_v20, %v391_v22  ;;  %v609_v28 = vpop.permute.xlu2 %608  ;;  %v2588_v20 = vld [vmem:[#allocation5 + $0x88] sm:$0xff] }
 0x112   : > { %v419_v27 = vmul.f32 %v415_v58, %v412_v26  ;;  %v420_v29 = vmul.f32 %v416_v59, %v408_v25  ;;  %v590_v25 = vperm.slane %v2372_v16, 6  ;;  %v591_v26 = vperm.slane %v2377_v17, 6 }
 0x114   : > { %781 = vmatpush.msra.mxu0 %v419_v27  ;;  %940 = vmatpush.msra.mxu3 %v420_v29 }
 0x115   : > { %1730 = vmatmul.msk.f32.gmra.mxu2 %vm730_vm4, %v2534_v30 }
 0x118   : > { %v397_v35 = vpop.permute.xlu0 %396  ;;  %v607_v37 = vpop.permute.xlu1 %606 }
 0x119   : > { %v407_v38 = vsel %vm406_vm5, %v389_v55, %v397_v35  ;;  %v411_v39 = vsel %vm406_vm5, %v397_v35, %v389_v55  ;;  %v624_v40 = vsel %vm616_vm6, %v615_v19, %v607_v37  ;;  %v620_v41 = vsel %vm616_vm6, %v607_v37, %v615_v19  ;;  %v2599_v37 = vld [vmem:[#allocation5 + $0xa0] sm:$0xff] }
 0x11a   : > { %v417_v42 = vmul.f32 %v415_v58, %v411_v39  ;;  %v418_v23 = vmul.f32 %v416_v59, %v407_v38  ;;  %v633_v45 = vmul.f32 %v625_v32, %v620_v41  ;;  %v634_v47 = vmul.f32 %v626_v33, %v624_v40  ;;  %v673_v58 = vld [vmem:[#allocation5 + $0x18] sm:$0xff] }
 0x11b   : > { %v570_v12 = vpop.permute.xlu2 %569 }
 0x11c   : > { %782 = vmatpush.msra.mxu0 %v417_v42  ;;  %941 = vmatpush.msra.mxu3 %v418_v23  ;;  %v682_v42 = vld [vmem:[#allocation5 + $0x60] sm:$0xff] }
 0x11d   : > { %783 = vmatmul.f32.vlgmr.msra.gmra.mxu0 %v670_v24  ;;  %1731 = vmatmul.msk.f32.gmra.mxu2 %vm730_vm4, %v2556_v43 }
 0x11e   : > { %1044 = vmatpush.msrb.mxu0 %v669_v48  ;;  %820 = vmatpush.msra.mxu1 %v633_v45  ;;  %v2611_v48 = vld [vmem:[#allocation5 + $0xb8] sm:$0xff] }
 0x11f   : > { %979 = vmatpush.msrb.mxu2 %v634_v47  ;;  %942 = vmatmul.f32.vlgmr.msra.gmra.mxu3 %v670_v24 }
 0x120   : > { %1045 = vmatpush.msrb.mxu0 %v667_v50  ;;  %v605_v51 = vpop.permute.xlu0 %604  ;;  %v613_v55 = vpop.permute.xlu1 %612 }
 0x121   : > { %v619_v21 = vsel %vm616_vm6, %v605_v51, %v613_v55  ;;  %v623_v44 = vsel %vm616_vm6, %v613_v55, %v605_v51  ;;  %v685_v51 = vld [vmem:[#allocation5 + $0x78] sm:$0xff] }
 0x122   : > { %1046 = vmatpush.msrb.mxu0 %v665_v54  ;;  %v631_v59 = vmul.f32 %v625_v32, %v619_v21  ;;  %v632_v60 = vmul.f32 %v626_v33, %v623_v44 }
 0x123   : > { %v576_v36 = vpop.permute.xlu2 %575 }
 0x124   : > { %1047 = vmatpush.msrb.mxu0 %v663_v56  ;;  %821 = vmatpush.msra.mxu1 %v631_v59  ;;  %v2619_v56 = vld [vmem:[#allocation5 + $0xd0] sm:$0xff]  ;;  %v556_v59 = vperm.slane %v2377_v17, 5 }
 0x125   : > { %786 = vmatmul.f32.gmra.mxu0 %v673_v58  ;;  %980 = vmatpush.msrb.mxu2 %v632_v60 }
 0x126   : > { %1732 = vmatmul.msk.f32.gmra.mxu2 %vm730_vm4, %v2576_v62 }
 0x127   : > { %945 = vmatmul.f32.gmra.mxu3 %v673_v58  ;;  %v555_v58 = vperm.slane %v2372_v16, 5 }
 0x128   : > { %v611_v52 = vpop.permute.xlu0 %610  ;;  %v601_v53 = vpop.permute.xlu1 %600 }
 0x129   : > { %v618_v63 = vsel %vm616_vm6, %v603_v31, %v611_v52  ;;  %v622_v8 = vsel %vm616_vm6, %v611_v52, %v603_v31  ;;  %v617_v9 = vsel %vm616_vm6, %v601_v53, %v609_v28  ;;  %v621_v10 = vsel %vm616_vm6, %v609_v28, %v601_v53  ;;  %v679_v31 = vld [vmem:[#allocation5 + $0x48] sm:$0xff] }
 0x12a   : > { %v629_v13 = vmul.f32 %v625_v32, %v618_v63  ;;  %v630_v15 = vmul.f32 %v626_v33, %v622_v8  ;;  %v627_v19 = vmul.f32 %v625_v32, %v617_v9  ;;  %v628_v22 = vmul.f32 %v626_v33, %v621_v10  ;;  %v688_v9 = vld [vmem:[#allocation5 + $0x90] sm:$0xff] }
 0x12b   : > { %v537_v50 = vpop.permute.xlu2 %536 }
 0x12c   : > { %822 = vmatpush.msra.mxu1 %v629_v13  ;;  %981 = vmatpush.msrb.mxu2 %v630_v15  ;;  %v2634_v13 = vld [vmem:[#allocation5 + $0xe8] sm:$0xff] }
 0x12d   : > { %789 = vmatmul.f32.gmra.mxu0 %v676_v11 }
 0x12e   : > { %1733 = vmatmul.msk.f32.gmra.mxu2 %vm730_vm4, %v2588_v20  ;;  %823 = vmatpush.msra.mxu1 %v627_v19 }
 0x12f   : > { %982 = vmatpush.msrb.mxu2 %v628_v22  ;;  %948 = vmatmul.f32.gmra.mxu3 %v676_v11 }
 0x131   : > { %v572_v27 = vpop.permute.xlu0 %571  ;;  %v580_v29 = vpop.permute.xlu1 %579 }
 0x132   : > { %v585_v32 = vsel %vm581_vm7, %v572_v27, %v580_v29  ;;  %v589_v33 = vsel %vm581_vm7, %v580_v29, %v572_v27 }
 0x133   : > { %v598_v34 = vmul.f32 %v590_v25, %v585_v32  ;;  %v599_v35 = vmul.f32 %v591_v26, %v589_v33  ;;  %v543_v60 = vpop.permute.xlu2 %542  ;;  %v2642_v32 = vld [vmem:[#allocation5 + $0x100] sm:$0xff] }
 0x135   : > { %792 = vmatmul.f32.gmra.mxu0 %v679_v31  ;;  %824 = vmatpush.msra.mxu1 %v598_v34 }
 0x136   : > { %983 = vmatpush.msrb.mxu2 %v599_v35 }
 0x137   : > { %1734 = vmatmul.msk.f32.gmra.mxu2 %vm730_vm4, %v2599_v37  ;;  %951 = vmatmul.f32.gmra.mxu3 %v679_v31 }
 0x139   : > { %v578_v38 = vpop.permute.xlu0 %577  ;;  %v568_v39 = vpop.permute.xlu1 %567 }
 0x13a   : > { %v584_v40 = vsel %vm581_vm7, %v570_v12, %v578_v38  ;;  %v588_v41 = vsel %vm581_vm7, %v578_v38, %v570_v12  ;;  %v583_v23 = vsel %vm581_vm7, %v568_v39, %v576_v36  ;;  %v587_v24 = vsel %vm581_vm7, %v576_v36, %v568_v39  ;;  %v694_v38 = vld [vmem:[#allocation5 + $0xc0] sm:$0xff] }
 0x13b   : > { %v596_v45 = vmul.f32 %v590_v25, %v584_v40  ;;  %v597_v46 = vmul.f32 %v591_v26, %v588_v41  ;;  %v594_v47 = vmul.f32 %v590_v25, %v583_v23  ;;  %v595_v49 = vmul.f32 %v591_v26, %v587_v24  ;;  %v531_v33 = vpop.permute.xlu2 %530  ;;  %v2650_v41 = vld [vmem:[#allocation5 + $0x118] sm:$0xff] }
 0x13c   : > { %v689_v24 = vld [vmem:[#allocation5 + $0x98] sm:$0xff] }
 0x13d   : > { %795 = vmatmul.f32.gmra.mxu0 %v682_v42  ;;  %825 = vmatpush.msra.mxu1 %v596_v45  ;;  %v692_v45 = vld [vmem:[#allocation5 + $0xb0] sm:$0xff] }
 0x13e   : > { %984 = vmatpush.msrb.mxu2 %v597_v46 }
 0x13f   : > { %1735 = vmatmul.msk.f32.gmra.mxu2 %vm730_vm4, %v2611_v48  ;;  %826 = vmatpush.msra.mxu1 %v594_v47  ;;  %v695_v47 = vld [vmem:[#allocation5 + $0xc8] sm:$0xff] }
 0x140   : > { %985 = vmatpush.msrb.mxu2 %v595_v49  ;;  %954 = vmatmul.f32.gmra.mxu3 %v682_v42  ;;  %v671_v42 = vld [vmem:[#allocation5 + $0x8] sm:$0xff] }
 0x141   : > { %v566_v61 = vpop.permute.xlu0 %565  ;;  %v574_v28 = vpop.permute.xlu1 %573 }
 0x142   : > { %v582_v54 = vsel %vm581_vm7, %v566_v61, %v574_v28  ;;  %v586_v55 = vsel %vm581_vm7, %v574_v28, %v566_v61  ;;  %v701_v28 = vld [vmem:[#allocation5 + $0xf8] sm:$0xff] }
 0x143   : > { %v592_v21 = vmul.f32 %v590_v25, %v582_v54  ;;  %v593_v44 = vmul.f32 %v591_v26, %v586_v55  ;;  %v691_v25 = vld [vmem:[#allocation5 + $0xa8] sm:$0xff]  ;;  %v704_v54 = vld [vmem:[#allocation5 + $0x110] sm:$0xff] }
 0x145   : > { %798 = vmatmul.f32.gmra.mxu0 %v685_v51  ;;  %827 = vmatpush.msra.mxu1 %v592_v21 }
 0x146   : > { %986 = vmatpush.msrb.mxu2 %v593_v44 }
 0x147   : > { %1736 = vmatmul.msk.f32.gmra.mxu2 %vm730_vm4, %v2619_v56 }
 0x148   : > { %957 = vmatmul.f32.gmra.mxu3 %v685_v51 }
 0x149   : > { %v545_v52 = vpop.permute.xlu0 %544  ;;  %v535_v53 = vpop.permute.xlu1 %534 }
 0x14a   : > { %v550_v63 = vsel %vm546_vm8, %v537_v50, %v545_v52  ;;  %v554_v8 = vsel %vm546_vm8, %v545_v52, %v537_v50  ;;  %v549_v10 = vsel %vm546_vm8, %v535_v53, %v543_v60  ;;  %v553_v11 = vsel %vm546_vm8, %v543_v60, %v535_v53  ;;  %v698_v50 = vld [vmem:[#allocation5 + $0xe0] sm:$0xff] }
 0x14b   : > { %v563_v16 = vmul.f32 %v555_v58, %v550_v63  ;;  %v561_v12 = vmul.f32 %v555_v58, %v549_v10  ;;  %v564_v17 = vmul.f32 %v556_v59, %v554_v8  ;;  %v562_v15 = vmul.f32 %v556_v59, %v553_v11  ;;  %v706_v60 = vld [vmem:[#allocation7] sm:$0xff]  ;;  %v707_v11 = vld [vmem:[#allocation7 + $0x8] sm:$0xff] }
 0x14d   : > { %801 = vmatmul.f32.gmra.mxu0 %v688_v9  ;;  %828 = vmatpush.msra.mxu1 %v563_v16 }
 0x14e   : > { %987 = vmatpush.msrb.mxu2 %v564_v17 }
 0x14f   : > { %829 = vmatpush.msra.mxu1 %v561_v12  ;;  %1737 = vmatmul.msk.f32.gmra.mxu2 %vm730_vm4, %v2634_v13 }
 0x150   : > { %988 = vmatpush.msrb.mxu2 %v562_v15  ;;  %960 = vmatmul.f32.gmra.mxu3 %v688_v9 }
 0x151   : > { %v533_v19 = vpop.permute.xlu0 %532  ;;  %v541_v22 = vpop.permute.xlu1 %540 }
 0x152   : > { %v548_v26 = vsel %vm546_vm8, %v533_v19, %v541_v22  ;;  %v552_v27 = vsel %vm546_vm8, %v541_v22, %v533_v19 }
 0x153   : > { %v559_v29 = vmul.f32 %v555_v58, %v548_v26  ;;  %v560_v31 = vmul.f32 %v556_v59, %v552_v27 }
 0x155   : > { %804 = vmatmul.f32.gmra.mxu0 %v691_v25  ;;  %830 = vmatpush.msra.mxu1 %v559_v29 }
 0x156   : > { %989 = vmatpush.msrb.mxu2 %v560_v31 }
 0x157   : > { %1738 = vmatmul.msk.f32.gmra.mxu2 %vm730_vm4, %v2642_v32 }
 0x158   : > { %963 = vmatmul.f32.gmra.mxu3 %v691_v25 }
 0x159   : > { %v539_v34 = vpop.permute.xlu0 %538 }
 0x15a   : > { %v547_v35 = vsel %vm546_vm8, %v531_v33, %v539_v34  ;;  %v551_v36 = vsel %vm546_vm8, %v539_v34, %v531_v33 }
 0x15b   : > { %v557_v39 = vmul.f32 %v555_v58, %v547_v35  ;;  %v558_v40 = vmul.f32 %v556_v59, %v551_v36 }
 0x15d   : > { %831 = vmatpush.msra.mxu1 %v557_v39  ;;  %807 = vmatmul.f32.gmra.mxu0 %v694_v38 }
 0x15e   : > { %990 = vmatpush.msrb.mxu2 %v558_v40 }
 0x15f   : > { %832 = vmatpush.msra.mxu1 %v2298_v0  ;;  %1739 = vmatmul.msk.f32.gmra.mxu2 %vm730_vm4, %v2650_v41  ;;  %v700_v0 = vld [vmem:[#allocation5 + $0xf0] sm:$0xff] }
 0x160   : > { %991 = vmatpush.msrb.mxu2 %v2307_v3  ;;  %966 = vmatmul.f32.gmra.mxu3 %v694_v38  ;;  %v674_v3 = vld [vmem:[#allocation5 + $0x20] sm:$0xff] }
 0x161   : > { %833 = vmatpush.msra.mxu1 %v2300_v1  ;;  %v703_v1 = vld [vmem:[#allocation5 + $0x108] sm:$0xff] }
 0x162   : > { %992 = vmatpush.msrb.mxu2 %v2309_v4  ;;  %v677_v4 = vld [vmem:[#allocation5 + $0x38] sm:$0xff] }
 0x163   : > { %834 = vmatpush.msra.mxu1 %v2304_v2  ;;  %v680_v2 = vld [vmem:[#allocation5 + $0x50] sm:$0xff] }
 0x164   : > { %993 = vmatpush.msrb.mxu2 %v2311_v5  ;;  %v683_v5 = vld [vmem:[#allocation5 + $0x68] sm:$0xff] }
 0x165   : > { %835 = vmatpush.msra.mxu1 %v2318_v7  ;;  %810 = vmatmul.f32.gmra.mxu0 %v697_v14  ;;  %v686_v7 = vld [vmem:[#allocation5 + $0x80] sm:$0xff] }
 0x166   : > { %836 = vmatmul.f32.vlgmr.msra.gmra.mxu1 %v671_v42  ;;  %994 = vmatpush.msrb.mxu2 %v2316_v6 }
 0x167   : > { %995 = vmatmul.f32.vlgmr.msrb.gmra.mxu2 %v671_v42 }
 0x168   : > { %969 = vmatmul.f32.gmra.mxu3 %v697_v14 }
 0x16d   : > { %813 = vmatmul.f32.gmra.mxu0 %v700_v0 }
 0x16e   : > { %839 = vmatmul.f32.gmra.mxu1 %v674_v3 }
 0x16f   : > { %998 = vmatmul.f32.gmra.mxu2 %v674_v3  ;;  %v716_v3 = vld [vmem:[#allocation7 + $0x50] sm:$0xff] }
 0x170   : > { %972 = vmatmul.f32.gmra.mxu3 %v700_v0 }
 0x175   : > { %816 = vmatmul.f32.gmra.mxu0 %v703_v1 }
 0x176   : > { %842 = vmatmul.f32.gmra.mxu1 %v677_v4 }
 0x177   : > { %1001 = vmatmul.f32.gmra.mxu2 %v677_v4 }
 0x178   : > { %975 = vmatmul.f32.gmra.mxu3 %v703_v1  ;;  %v717_v1 = vld [vmem:[#allocation7 + $0x58] sm:$0xff] }
 0x17d   : > { %1740 = vmatmul.msk.f32.vlgmr.msrb.gmra.mxu0 %vm730_vm4, %v2511_v57 }
 0x17e   : > { %845 = vmatmul.f32.gmra.mxu1 %v680_v2 }
 0x17f   : > { %1004 = vmatmul.f32.gmra.mxu2 %v680_v2 }
 0x185   : > { %1741 = vmatmul.msk.f32.gmra.mxu0 %vm730_vm4, %v2526_v18 }
 0x186   : > { %848 = vmatmul.f32.gmra.mxu1 %v683_v5 }
 0x187   : > { %1007 = vmatmul.f32.gmra.mxu2 %v683_v5 }
 0x188   : > { %v2666_v6 = vpop.f32.mrf.mxu2 }
 0x18d   : > { %1742 = vmatmul.msk.f32.gmra.mxu0 %vm730_vm4, %v2534_v30 }
 0x18e   : > { %851 = vmatmul.f32.gmra.mxu1 %v686_v7 }
 0x18f   : > { %1010 = vmatmul.f32.gmra.mxu2 %v686_v7 }
 0x190   : > { %v2670_v23 = vpop.f32.mrf.mxu2 }
 0x195   : > { %1743 = vmatmul.msk.f32.gmra.mxu0 %vm730_vm4, %v2556_v43 }
 0x196   : > { %854 = vmatmul.f32.gmra.mxu1 %v689_v24 }
 0x197   : > { %1013 = vmatmul.f32.gmra.mxu2 %v689_v24  ;;  %v711_v24 = vld [vmem:[#allocation7 + $0x28] sm:$0xff] }
 0x198   : > { %v2674_v57 = vpop.f32.mrf.mxu2 }
 0x19a   : > { %v784_v18 = vpop.f32.mrf.mxu0 }
 0x19b   : > { %v785_v53 = vadd.f32 %v784_v18, %v706_v60 }
 0x19d   : > { %1744 = vmatmul.msk.f32.gmra.mxu0 %vm730_vm4, %v2576_v62 }
 0x19e   : > { %857 = vmatmul.f32.gmra.mxu1 %v692_v45 }
 0x19f   : > { %1016 = vmatmul.f32.gmra.mxu2 %v692_v45 }
 0x1a0   : > { %v2678_v30 = vpop.f32.mrf.mxu2 }
 0x1a2   : > { %v2680_v46 = vpop.f32.mrf.mxu0  ;;  %v943_v52 = vpop.f32.mrf.mxu3 }
 0x1a3   : > { %v944_v16 = vadd.f32 %v943_v52, %v707_v11  ;;  %v719_v52 = vld [vmem:[#allocation7 + $0x68] sm:$0xff] }
 0x1a5   : > { %1745 = vmatmul.msk.f32.gmra.mxu0 %vm730_vm4, %v2588_v20 }
 0x1a6   : > { %860 = vmatmul.f32.gmra.mxu1 %v695_v47 }
 0x1a7   : > { %1019 = vmatmul.f32.gmra.mxu2 %v695_v47  ;;  %v710_v47 = vld [vmem:[#allocation7 + $0x20] sm:$0xff] }
 0x1a9   : > { %v2684_v43 = vpop.f32.mrf.mxu2 }
 0x1aa   : > { %v2686_v49 = vpop.f32.mrf.mxu0  ;;  %v2728_v15 = vpop.f32.mrf.mxu3 }
 0x1ad   : > { %1746 = vmatmul.msk.f32.gmra.mxu0 %vm730_vm4, %v2599_v37 }
 0x1ae   : > { %863 = vmatmul.f32.gmra.mxu1 %v698_v50 }
 0x1af   : > { %1022 = vmatmul.f32.gmra.mxu2 %v698_v50 }
 0x1b1   : > { %v2690_v62 = vpop.f32.mrf.mxu2 }
 0x1b2   : > { %v2692_v61 = vpop.f32.mrf.mxu0  ;;  %v949_v26 = vpop.f32.mrf.mxu3 }
 0x1b3   : > { %v950_v50 = vadd.f32 %v949_v26, %v711_v24  ;;  %v721_v24 = vld [vmem:[#allocation7 + $0x78] sm:$0xff] }
 0x1b5   : > { %1747 = vmatmul.msk.f32.gmra.mxu0 %vm730_vm4, %v2611_v48 }
 0x1b6   : > { %866 = vmatmul.f32.gmra.mxu1 %v701_v28 }
 0x1b7   : > { %1025 = vmatmul.f32.gmra.mxu2 %v701_v28 }
 0x1ba   : > { %v2696_v20 = vpop.f32.mrf.mxu0  ;;  %v2698_v51 = vpop.f32.mrf.mxu2 }
 0x1bb   : > { %v2738_v33 = vpop.f32.mrf.mxu3 }
 0x1bd   : > { %1748 = vmatmul.msk.f32.gmra.mxu0 %vm730_vm4, %v2619_v56 }
 0x1be   : > { %869 = vmatmul.f32.gmra.mxu1 %v704_v54 }
 0x1bf   : > { %1028 = vmatmul.f32.gmra.mxu2 %v704_v54  ;;  %v718_v54 = vld [vmem:[#allocation7 + $0x60] sm:$0xff] }
 0x1c2   : > { %v799_v37 = vpop.f32.mrf.mxu0  ;;  %v2702_v55 = vpop.f32.mrf.mxu2 }
 0x1c3   : > { %v955_v39 = vpop.f32.mrf.mxu3  ;;  %v800_v5 = vadd.f32 %v799_v37, %v716_v3 }
 0x1c5   : > { %1749 = vmatmul.msk.f32.gmra.mxu0 %vm730_vm4, %v2634_v13 }
 0x1ca   : > { %v802_v21 = vpop.f32.mrf.mxu0  ;;  %v2706_v48 = vpop.f32.mrf.mxu2 }
 0x1cb   : > { %v958_v42 = vpop.f32.mrf.mxu3 }
 0x1cc   : > { %v959_v7 = vadd.f32 %v958_v42, %v717_v1 }
 0x1cd   : > { %1750 = vmatmul.msk.f32.gmra.mxu0 %vm730_vm4, %v2642_v32 }
 0x1d2   : > { %v2710_v44 = vpop.f32.mrf.mxu0  ;;  %v2712_v58 = vpop.f32.mrf.mxu2 }
 0x1d3   : > { %v961_v45 = vpop.f32.mrf.mxu3 }
 0x1d5   : > { %1751 = vmatmul.msk.f32.gmra.mxu0 %vm730_vm4, %v2650_v41 }
 0x1da   : > { %v2716_v56 = vpop.f32.mrf.mxu0  ;;  %v2718_v59 = vpop.f32.mrf.mxu2 }
 0x1e2   : > { %v2720_v63 = vpop.f32.mrf.mxu0  ;;  %v2722_v8 = vpop.f32.mrf.mxu2 }
 0x1e3   : > { %v837_v9 = vpop.f32.mrf.mxu1 }
 0x1e4   : > { %v2724_v10 = vadd.f32 %v837_v9, %v785_v53  ;;  %v791_v9 = vadd.f32 %v2686_v49, %v710_v47 }
 0x1ea   : > { %v2726_v12 = vpop.f32.mrf.mxu0  ;;  %v996_v17 = vpop.f32.mrf.mxu2 }
 0x1eb   : > { %v997_v13 = vadd.f32 %v996_v17, %v944_v16  ;;  %v2730_v19 = vpop.f32.mrf.mxu1  ;;  %v803_v17 = vadd.f32 %v802_v21, %v718_v54 }
 0x1f2   : > { %v2732_v22 = vpop.f32.mrf.mxu0  ;;  %v2734_v25 = vpop.f32.mrf.mxu2 }
 0x1f3   : > { %v843_v27 = vpop.f32.mrf.mxu1 }
 0x1f4   : > { %v844_v42 = vadd.f32 %v843_v27, %v791_v9  ;;  %v964_v27 = vpop.f32.mrf.mxu3 }
 0x1fa   : > { %v1049_v29 = vpop.f32.mrf.mxu0  ;;  %v1002_v31 = vpop.f32.mrf.mxu2 }
 0x1fb   : > { %v2736_v32 = vadd.f32 %v1049_v29, %v997_v13  ;;  %v2740_v34 = vpop.f32.mrf.mxu1  ;;  %v1003_v13 = vadd.f32 %v1002_v31, %v950_v50  ;;  %v962_v29 = vadd.f32 %v961_v45, %v719_v52  ;;  %v2761_v31 = vadd.f32 %v2674_v57, %v844_v42  ;;  %v708_v42 = vld [vmem:[#allocation7 + $0x10] sm:$0xff] }
 0x1fc   : > { %v965_v57 = vadd.f32 %v964_v27, %v721_v24  ;;  %v712_v24 = vld [vmem:[#allocation7 + $0x30] sm:$0xff] }
 0x202   : > { %v2742_v35 = vpop.f32.mrf.mxu0  ;;  %v2744_v36 = vpop.f32.mrf.mxu2 }
 0x203   : > { %v849_v40 = vpop.f32.mrf.mxu1 }
 0x20a   : > { %v1055_v38 = vpop.f32.mrf.mxu0  ;;  %v1008_v41 = vpop.f32.mrf.mxu2 }
 0x20b   : > { %v852_v0 = vpop.f32.mrf.mxu1 }
 0x20c   : > { %v853_v18 = vadd.f32 %v852_v0, %v800_v5  ;;  %v715_v0 = vld [vmem:[#allocation7 + $0x48] sm:$0xff]  ;;  %v2758_v5 = vadd.f32 %v1055_v38, %v1003_v13  ;;  %v709_v38 = vld [vmem:[#allocation7 + $0x18] sm:$0xff] }
 0x20d   : > { %v956_v49 = vadd.f32 %v955_v39, %v715_v0 }
 0x20e   : > { %v2749_v53 = vadd.f32 %v2690_v62, %v853_v18  ;;  %v714_v62 = vld [vmem:[#allocation7 + $0x40] sm:$0xff]  ;;  %v1098_v39 = vmul.f32 %v2758_v5, %v2758_v5 }
 0x20f   : > { %v797_v45 = vadd.f32 %v2696_v20, %v714_v62  ;;  %v1009_v54 = vadd.f32 %v1008_v41, %v956_v49  ;;  %v713_v62 = vld [vmem:[#allocation7 + $0x38] sm:$0xff] }
 0x210   : > { %v1167_v1 = vmul.f32 %v2749_v53, %v2749_v53 }
 0x211   : > { %v850_v9 = vadd.f32 %v849_v40, %v797_v45  ;;  %v794_v45 = vadd.f32 %v2692_v61, %v712_v24 }
 0x212   : > { %v2746_v14 = vpop.f32.mrf.mxu0  ;;  %v1011_v4 = vpop.f32.mrf.mxu2 }
 0x213   : > { %v1012_v28 = vadd.f32 %v1011_v4, %v959_v7  ;;  %v855_v60 = vpop.f32.mrf.mxu1  ;;  %v720_v4 = vld [vmem:[#allocation7 + $0x70] sm:$0xff]  ;;  %v2782_v0 = vadd.f32 %v2684_v43, %v850_v9 }
 0x214   : > { %v856_v3 = vadd.f32 %v855_v60, %v803_v17  ;;  %v806_v47 = vadd.f32 %v2710_v44, %v720_v4 }
 0x215   : > { %v1165_v49 = vmul.f32 %v2782_v0, %v2782_v0 }
 0x216   : > { %v2764_v18 = vadd.f32 %v2698_v51, %v856_v3  ;;  %v1097_v51 = vmul.f32 %v2761_v31, %v2761_v31 }
 0x218   : > { %v1169_v44 = vmul.f32 %v2764_v18, %v2764_v18 }
 0x21a   : > { %v1061_v2 = vpop.f32.mrf.mxu0  ;;  %v1014_v16 = vpop.f32.mrf.mxu2 }
 0x21b   : > { %v1015_v7 = vadd.f32 %v1014_v16, %v962_v29  ;;  %v858_v50 = vpop.f32.mrf.mxu1  ;;  %v947_v16 = vadd.f32 %v2728_v15, %v709_v38  ;;  %v2779_v17 = vadd.f32 %v1061_v2, %v1009_v54  ;;  %v1107_v29 = vadd.f32 %v1098_v39, %v1097_v51 }
 0x21d   : > { %v1166_v15 = vmul.f32 %v2779_v17, %v2779_v17 }
 0x222   : > { %v1064_v11 = vpop.f32.mrf.mxu0  ;;  %v1017_v52 = vpop.f32.mrf.mxu2 }
 0x223   : > { %v2752_v37 = vadd.f32 %v1064_v11, %v1012_v28  ;;  %v859_v11 = vadd.f32 %v858_v50, %v806_v47  ;;  %v1018_v41 = vadd.f32 %v1017_v52, %v965_v57  ;;  %v847_v50 = vadd.f32 %v2740_v34, %v794_v45 }
 0x225   : > { %v1168_v26 = vmul.f32 %v2752_v37, %v2752_v37  ;;  %v2785_v40 = vadd.f32 %v2702_v55, %v859_v11  ;;  %v2826_v38 = vadd.f32 %v2678_v30, %v847_v50  ;;  %v2835_v30 = vpop.f32.mrf.mxu1 }
 0x227   : > { %v1176_v21 = vadd.f32 %v1168_v26, %v1167_v1  ;;  %v788_v26 = vadd.f32 %v2680_v46, %v708_v42  ;;  %v1000_v1 = vadd.f32 %v2734_v25, %v947_v16  ;;  %v1171_v55 = vmul.f32 %v2785_v40, %v2785_v40 }
 0x228   : > { %v953_v25 = vadd.f32 %v2738_v33, %v713_v62  ;;  %v1099_v34 = vmul.f32 %v2826_v38, %v2826_v38 }
 0x229   : > { %1177 = vadd.xlane.f32.xlu0 %v1176_v21  ;;  %v841_v4 = vadd.f32 %v2730_v19, %v788_v26  ;;  %v2801_v46 = vadd.f32 %v2742_v35, %v1000_v1  ;;  %v1173_v21 = vadd.f32 %v1166_v15, %v1165_v49  ;;  %v2806_v19 = vadd.f32 %v2666_v6, %v2724_v10 }
 0x22a   : > { %v1067_v28 = vpop.f32.mrf.mxu0  ;;  %v1094_v35 = vmul.f32 %v2736_v32, %v2736_v32  ;;  %v1006_v47 = vadd.f32 %v2744_v36, %v953_v25 }
 0x22b   : > { %v2770_v60 = vadd.f32 %v1067_v28, %v1015_v7  ;;  %v2809_v27 = vadd.f32 %v2670_v23, %v841_v4  ;;  %v1096_v33 = vmul.f32 %v2801_v46, %v2801_v46  ;;  %v1093_v23 = vmul.f32 %v2806_v19, %v2806_v19 }
 0x22c   : > { %v2823_v10 = vadd.f32 %v2746_v14, %v1006_v47 }
 0x22d   : > { %v1170_v20 = vmul.f32 %v2770_v60, %v2770_v60  ;;  %v1095_v6 = vmul.f32 %v2809_v27, %v2809_v27  ;;  %v1101_v28 = vadd.f32 %v1094_v35, %v1093_v23  ;;  %v2844_v42 = vpop.f32.mrf.mxu1 }
 0x22e   : > { %v1100_v36 = vmul.f32 %v2823_v10, %v2823_v10 }
 0x22f   : > { %v1179_v13 = vadd.f32 %v1170_v20, %v1169_v44  ;;  %v1104_v61 = vadd.f32 %v1096_v33, %v1095_v6 }
 0x230   : > { %v1110_v39 = vadd.f32 %v1100_v36, %v1099_v34 }
 0x231   : > { %1180 = vadd.xlane.f32.xlu2 %v1179_v13  ;;  %1108 = vadd.xlane.f32.xlu0 %v1107_v29 }
 0x232   : > { %v1070_v3 = vpop.f32.mrf.mxu0 }
 0x233   : > { %v2791_v2 = vadd.f32 %v1070_v3, %v1018_v41 }
 0x235   : > { %v1172_v43 = vmul.f32 %v2791_v2, %v2791_v2 }
 0x237   : > { %v1182_v7 = vadd.f32 %v1172_v43, %v1171_v55 }
 0x239   : > { %1183 = vadd.xlane.f32.xlu1 %v1182_v7  ;;  %1174 = vadd.xlane.f32.xlu2 %v1173_v21 }
 0x241   : > { %1105 = vadd.xlane.f32.xlu2 %v1104_v61  ;;  %1102 = vadd.xlane.f32.xlu1 %v1101_v28  ;;  %v2862_v61 = vpop.f32.mrf.mxu1 }
 0x249   : > { %1111 = vadd.xlane.f32.xlu1 %v1110_v39 }
 0x29c   : > { %v1178_v54 = vpop.xlane.xlu0 %1177 }
 0x29d   : > { %v2832_v57 = vmax.f32 %v1178_v54, 1e-24 }
 0x29f   : > { %1873 = vrsqrt.f32 %v2832_v57  ;;  %vm1205_vm0 = vweird.f32 %v2832_v57 }
 0x2a4   : > { %v1181_v14 = vpop.xlane.xlu2 %1180  ;;  %v1109_v21 = vpop.xlane.xlu0 %1108 }
 0x2a5   : > { %v1187_v52 = vmax.f32 %v1181_v14, 1e-24  ;;  %v2837_v51 = vpop.eup %1873  ;;  %v2858_v47 = vmax.f32 %v1109_v21, 1e-24 }
 0x2a6   : > { %v1200_v13 = vmul.f32 %v2837_v51, %v2832_v57  ;;  %vm1206_vm14 = vweird.f32 %v2837_v51 }
 0x2a7   : > { %1875 = vrsqrt.f32 %v1187_v52  ;;  %vm1215_vm13 = vweird.f32 %v1187_v52  ;;  %vm1207_vm1 = vmor %vm1205_vm0, %vm1206_vm14 }
 0x2a8   : > { %v1201_v3 = vmul.f32 %v2837_v51, %v1200_v13 }
 0x2aa   : > { %v1202_v7 = vmul.f32 0.5, %v1201_v3 }
 0x2ac   : > { %v1184_v9 = vpop.xlane.xlu1 %1183  ;;  %v1175_v11 = vpop.xlane.xlu2 %1174  ;;  %v1203_v50 = vsub.f32 1.5, %v1202_v7  ;;  %v726_v7 = vld [vmem:[#allocation7 + $0xa0] sm:$0xff] }
 0x2ad   : > { %v1876_v20 = vpop.eup %1875  ;;  %v1188_v44 = vmax.f32 %v1184_v9, 1e-24  ;;  %v2839_v16 = vmax.f32 %v1175_v11, 1e-24 }
 0x2ae   : > { %v1210_v41 = vmul.f32 %v1876_v20, %v1187_v52  ;;  %vm1216_vm10 = vweird.f32 %v1876_v20  ;;  %v1204_v9 = vmul.f32 %v2837_v51, %v1203_v50  ;;  %v815_v50 = vadd.f32 %v2726_v12, %v726_v7  ;;  %v729_v7 = vld [vmem:[#allocation7 + $0xb8] sm:$0xff] }
 0x2af   : > { %1877 = vrsqrt.f32 %v1188_v44  ;;  %vm1225_vm11 = vweird.f32 %v1188_v44  ;;  %vm1217_vm15 = vmor %vm1215_vm13, %vm1216_vm10  ;;  %vm1195_vm3 = vweird.f32 %v2839_v16  ;;  %vm1143_vm13 = vweird.f32 %v2858_v47 }
 0x2b0   : > { %1879 = vrsqrt.f32 %v2839_v16  ;;  %v1211_v29 = vmul.f32 %v1876_v20, %v1210_v41  ;;  %v868_v12 = vadd.f32 %v2862_v61, %v815_v50 }
 0x2b2   : > { %v1212_v55 = vmul.f32 0.5, %v1211_v29 }
 0x2b4   : > { %v1106_v26 = vpop.xlane.xlu2 %1105  ;;  %v1103_v1 = vpop.xlane.xlu1 %1102  ;;  %v1213_v45 = vsub.f32 1.5, %v1212_v55  ;;  %v1208_v55 = vsel %vm1207_vm1, %v2837_v51, %v1204_v9  ;;  %v722_v51 = vld [vmem:[#allocation7 + $0x80] sm:$0xff] }
 0x2b5   : > { %v1878_v15 = vpop.eup %1877  ;;  %v2847_v62 = vmax.f32 %v1106_v26, 1e-24  ;;  %v2849_v4 = vmax.f32 %v1103_v1, 1e-24  ;;  %v728_v1 = vld [vmem:[#allocation7 + $0xb0] sm:$0xff] }
 0x2b6   : > { %v2851_v43 = vpop.eup %1879  ;;  %v1220_v49 = vmul.f32 %v1878_v15, %v1188_v44  ;;  %vm1226_vm9 = vweird.f32 %v1878_v15  ;;  %v1214_v39 = vmul.f32 %v1876_v20, %v1213_v45  ;;  %v818_v21 = vadd.f32 %v2732_v22, %v728_v1 }
 0x2b7   : > { %v1190_v25 = vmul.f32 %v2851_v43, %v2839_v16  ;;  %1881 = vrsqrt.f32 %v2847_v62  ;;  %vm1227_vm12 = vmor %vm1225_vm11, %vm1226_vm9  ;;  %vm1196_vm2 = vweird.f32 %v2851_v43  ;;  %vm1123_vm7 = vweird.f32 %v2849_v4 }
 0x2b8   : > { %v1221_v24 = vmul.f32 %v1878_v15, %v1220_v49  ;;  %1883 = vrsqrt.f32 %v2849_v4  ;;  %v1218_v3 = vsel %vm1217_vm15, %v1876_v20, %v1214_v39  ;;  %vm1197_vm6 = vmor %vm1195_vm3, %vm1196_vm2  ;;  %v2118_v39 = vmov 0  }
 0x2b9   : > { %v1191_v33 = vmul.f32 %v2851_v43, %v1190_v25  ;;  %1885 = vrsqrt.f32 %v2858_v47  ;;  %v1233_v25 = vmul.f32 %v1218_v3, %v2764_v18  ;;  %v1234_v57 = vmul.f32 %v1218_v3, %v2770_v60  ;;  %v724_v60 = vld [vmem:[#allocation7 + $0x90] sm:$0xff]  ;;  %1869 = vset.pattern.permute.xlu0 %v2118_v39  ;;  %1870 = vset.pattern.permute.xlu1 %v2118_v39 }
 0x2ba   : > { %v1222_v35 = vmul.f32 0.5, %v1221_v24  ;;  %v870_v24 = vpop.f32.mrf.mxu1  ;;  %v1231_v18 = vmul.f32 %v1208_v55, %v2749_v53  ;;  %v1086_v53 = vld [vmem:[%s3058_s4 + $0x8] sm:$0xff]  ;;  %1868 = vset.pattern.permute.xlu2 %v2118_v39  ;;  %vm1133_vm10 = vweird.f32 %v2847_v62 }
 0x2bb   : > { %v1192_v36 = vmul.f32 0.5, %v1191_v33  ;;  %v1232_v33 = vmul.f32 %v1208_v55, %v2752_v37  ;;  %v809_v37 = vadd.f32 %v2716_v56, %v722_v51  ;;  %1302 = vperm.xlu0 %1869, %v1086_v53  }
 0x2bc   : > { %v1223_v6 = vsub.f32 1.5, %v1222_v35  ;;  %v1112_v41 = vpop.xlane.xlu1 %1111 }
 0x2bd   : > { %v2860_v23 = vpop.eup %1881  ;;  %v1193_v52 = vsub.f32 1.5, %v1192_v36  ;;  %v1087_v36 = vld [vmem:[%s3058_s4 + $0x10] sm:$0xff] }
 0x2be   : > { %v2864_v28 = vpop.eup %1883  ;;  %v1224_v34 = vmul.f32 %v1878_v15, %v1223_v6  ;;  %v1128_v11 = vmul.f32 %v2860_v23, %v2847_v62  ;;  %v871_v6 = vadd.f32 %v870_v24, %v818_v21  ;;  %1307 = vperm.xlu1 %1870, %v1087_v36   ;;  %vm1134_vm9 = vweird.f32 %v2860_v23 }
 0x2bf   : > { %v1118_v54 = vmul.f32 %v2864_v28, %v2849_v4  ;;  %v2881_v49 = vpop.eup %1885  ;;  %v1194_v20 = vmul.f32 %v2851_v43, %v1193_v52  ;;  %vm1124_vm5 = vweird.f32 %v2864_v28  ;;  %vm1135_vm11 = vmor %vm1133_vm10, %vm1134_vm9 }
 0x2c0   : > { %v1228_v14 = vsel %vm1227_vm12, %v1878_v15, %v1224_v34  ;;  %v2878_v15 = vmax.f32 %v1112_v41, 1e-24  ;;  %v1138_v45 = vmul.f32 %v2881_v49, %v2858_v47  ;;  %v812_v34 = vadd.f32 %v2720_v63, %v724_v60  ;;  %vm1125_vm8 = vmor %vm1123_vm7, %vm1124_vm5  ;;  %v1085_v63 = vld [vmem:[%s3058_s4] sm:$0xff] }
 0x2c1   : > { %v1119_v44 = vmul.f32 %v2864_v28, %v1118_v54  ;;  %v1235_v13 = vmul.f32 %v1228_v14, %v2785_v40  ;;  %v1236_v29 = vmul.f32 %v1228_v14, %v2791_v2  ;;  %v1129_v40 = vmul.f32 %v2860_v23, %v1128_v11  ;;  %1297 = vperm.xlu2 %1868, %v1085_v63  }
 0x2c2   : > { %1887 = vrsqrt.f32 %v2878_v15  ;;  %v1198_v16 = vsel %vm1197_vm6, %v2851_v43, %v1194_v20  ;;  %v1139_v43 = vmul.f32 %v2881_v49, %v1138_v45  ;;  %v924_v9 = vadd.f32 %v2722_v8, %v871_v6  ;;  %v725_v45 = vld [vmem:[#allocation7 + $0x98] sm:$0xff] }
 0x2c3   : > { %v1120_v26 = vmul.f32 0.5, %v1119_v44  ;;  %1249 = vmatpush.xpose.msrb.mxu1 %v1235_v13  ;;  %1278 = vmatpush.xpose.msrb.mxu3 %v1236_v29  ;;  %v1130_v35 = vmul.f32 0.5, %v1129_v40  ;;  %v1229_v14 = vmul.f32 %v1198_v16, %v2782_v0  ;;  %v1230_v56 = vmul.f32 %v1198_v16, %v2779_v17  ;;  %v1088_v29 = vld [vmem:[%s3058_s4 + $0x18] sm:$0xff]  ;;  %v967_v40 = vpop.f32.mrf.mxu3 }
 0x2c4   : > { %v862_v11 = vadd.f32 %v2835_v30, %v809_v37  ;;  %v865_v44 = vadd.f32 %v2844_v42, %v812_v34  ;;  %v921_v17 = vadd.f32 %v2718_v59, %v868_v12  ;;  %v1140_v41 = vmul.f32 0.5, %v1139_v43 }
 0x2c5   : > { %v1121_v2 = vsub.f32 1.5, %v1120_v26  ;;  %v1131_v54 = vsub.f32 1.5, %v1130_v35  ;;  %vm1144_vm12 = vweird.f32 %v2881_v49  ;;  %vm1153_vm0 = vweird.f32 %v2878_v15 }
 0x2c6   : > { %v918_v30 = vadd.f32 %v2712_v58, %v865_v44  ;;  %v915_v59 = vadd.f32 %v2706_v48, %v862_v11  ;;  %vm1145_vm14 = vmor %vm1143_vm13, %vm1144_vm12 }
 0x2c7   : > { %1250 = vmatpush.xpose.msrb.mxu1 %v1233_v25  ;;  %1279 = vmatpush.xpose.msrb.mxu3 %v1234_v57  ;;  %v1122_v22 = vmul.f32 %v2864_v28, %v1121_v2  ;;  %v1132_v8 = vmul.f32 %v2860_v23, %v1131_v54  ;;  %v1020_v2 = vpop.f32.mrf.mxu2 }
 0x2c8   : > { %v1888_v61 = vpop.eup %1887 }
 0x2c9   : > { %v1126_v4 = vsel %vm1125_vm8, %v2864_v28, %v1122_v22  ;;  %v1148_v13 = vmul.f32 %v1888_v61, %v2878_v15  ;;  %v1136_v42 = vsel %vm1135_vm11, %v2860_v23, %v1132_v8  ;;  %1312 = vperm.xlu2 %1868, %v1088_v29   ;;  %vm1154_vm15 = vweird.f32 %v1888_v61  ;;  %v727_v15 = vld [vmem:[#allocation7 + $0xa8] sm:$0xff] }
 0x2ca   : > { %v1157_v0 = vmul.f32 %v1126_v4, %v2806_v19  ;;  %v1158_v28 = vmul.f32 %v1126_v4, %v2736_v32  ;;  %v1141_v19 = vsub.f32 1.5, %v1140_v41  ;;  %v1159_v52 = vmul.f32 %v1136_v42, %v2809_v27  ;;  %vm1155_vm1 = vmor %vm1153_vm0, %vm1154_vm15 }
 0x2cb   : > { %1251 = vmatpush.xpose.msrb.mxu1 %v1231_v18  ;;  %1280 = vmatpush.xpose.msrb.mxu3 %v1232_v33  ;;  %v1149_v32 = vmul.f32 %v1888_v61, %v1148_v13  ;;  %v1160_v58 = vmul.f32 %v1136_v42, %v2801_v46 }
 0x2cc   : > { %v1142_v3 = vmul.f32 %v2881_v49, %v1141_v19  ;;  %v1091_v19 = vld [vmem:[%s3059_s5 + $0x10] sm:$0xff] }
 0x2cd   : > { %v1150_v62 = vmul.f32 0.5, %v1149_v32 }
 0x2ce   : > { %v1146_v23 = vsel %vm1145_vm14, %v2881_v49, %v1142_v3  ;;  %v970_v49 = vpop.f32.mrf.mxu3 }
 0x2cf   : > { %1252 = vmatpush.xpose.msrb.mxu1 %v1229_v14  ;;  %1281 = vmatpush.xpose.msrb.mxu3 %v1230_v56  ;;  %v1151_v48 = vsub.f32 1.5, %v1150_v62  ;;  %v1161_v26 = vmul.f32 %v1146_v23, %v2761_v31  ;;  %v1162_v27 = vmul.f32 %v1146_v23, %v2758_v5  ;;  %v1073_v31 = vpop.f32.mrf.mxu0  ;;  %v1023_v5 = vpop.f32.mrf.mxu2  ;;  %v1089_v14 = vld [vmem:[%s3059_s5] sm:$0xff] }
 0x2d1   : > { %v1152_v1 = vmul.f32 %v1888_v61, %v1151_v48  ;;  %v1092_v48 = vld [vmem:[%s3059_s5 + $0x18] sm:$0xff] }
 0x2d2   : > { %1253 = vmatmul.f32.vlgmr.msrb.gmra.mxu1 %v1157_v0  ;;  %1282 = vmatmul.f32.vlgmr.msrb.gmra.mxu3 %v1158_v28 }
 0x2d3   : > { %1443 = vmatpush.msra.mxu1 %v924_v9  ;;  %v1156_v46 = vsel %vm1155_vm1, %v1888_v61, %v1152_v1 }
 0x2d4   : > { %v1163_v55 = vmul.f32 %v1156_v46, %v2826_v38  ;;  %v1164_v47 = vmul.f32 %v1156_v46, %v2823_v10  ;;  %v723_v38 = vld [vmem:[#allocation7 + $0x88] sm:$0xff]  ;;  %v971_v10 = vadd.f32 %v970_v49, %v725_v45 }
 0x2d5   : > { %1444 = vmatpush.msra.mxu1 %v921_v17  ;;  %v968_v22 = vadd.f32 %v967_v40, %v723_v38  ;;  %v1090_v17 = vld [vmem:[%s3059_s5 + $0x8] sm:$0xff] }
 0x2d6   : > { %v973_v25 = vpop.f32.mrf.mxu3  ;;  %v1024_v16 = vadd.f32 %v1023_v5, %v971_v10  ;;  %v1494_v10 = vld [vmem:[%s3061_s7 + $0x8] sm:$0xff] }
 0x2d7   : > { %1445 = vmatpush.msra.mxu1 %v918_v30  ;;  %v1076_v57 = vpop.f32.mrf.mxu0  ;;  %v1026_v20 = vpop.f32.mrf.mxu2  ;;  %v974_v18 = vadd.f32 %v973_v25, %v727_v15  ;;  %v1021_v36 = vadd.f32 %v1020_v2, %v968_v22 }
 0x2d8   : > { %v1077_v37 = vadd.f32 %v1076_v57, %v1024_v16 }
 0x2d9   : > { %1446 = vmatpush.msra.mxu1 %v915_v59  ;;  %v1027_v50 = vadd.f32 %v1026_v20, %v974_v18  ;;  %v1074_v34 = vadd.f32 %v1073_v31, %v1021_v36 }
 0x2da   : > { %1256 = vmatmul.f32.gmra.mxu1 %v1159_v52  ;;  %1285 = vmatmul.f32.gmra.mxu3 %v1160_v58 }
 0x2de   : > { %v976_v21 = vpop.f32.mrf.mxu3 }
 0x2df   : > { %v1079_v24 = vpop.f32.mrf.mxu0  ;;  %v977_v51 = vadd.f32 %v976_v21, %v729_v7  ;;  %v1029_v60 = vpop.f32.mrf.mxu2 }
 0x2e0   : > { %v1080_v53 = vadd.f32 %v1079_v24, %v1027_v50 }
 0x2e1   : > { %v1030_v35 = vadd.f32 %v1029_v60, %v977_v51  ;;  %v1493_v60 = vld [vmem:[%s3061_s7] sm:$0xff] }
 0x2e2   : > { %1259 = vmatmul.f32.gmra.mxu1 %v1161_v26  ;;  %1288 = vmatmul.f32.gmra.mxu3 %v1162_v27 }
 0x2e7   : > { %v1082_v33 = vpop.f32.mrf.mxu0 }
 0x2e8   : > { %v1083_v6 = vadd.f32 %v1082_v33, %v1030_v35  ;;  %v1496_v35 = vld [vmem:[%s3061_s7 + $0x18] sm:$0xff]  ;;  %v1495_v33 = vld [vmem:[%s3061_s7 + $0x10] sm:$0xff] }
 0x2ea   : > { %1262 = vmatmul.f32.gmra.mxu1 %v1163_v55  ;;  %1291 = vmatmul.f32.gmra.mxu3 %v1164_v47 }
 0x2eb   : > { %1472 = vmatpush.msra.mxu3 %v1083_v6 }
 0x2ed   : > { %1473 = vmatpush.msra.mxu3 %v1080_v53 }
 0x2ef   : > { %1474 = vmatpush.msra.mxu3 %v1077_v37 }
 0x2f1   : > { %1475 = vmatpush.msra.mxu3 %v1074_v34 }
 0x31b   : > { %v1298_v54 = vpop.permute.xlu2 %1297 }
 0x323   : > { %v1313_v3 = vpop.permute.xlu2 %1312 }
 0x32d   : > { %v1303_v11 = vpop.permute.xlu0 %1302 }
 0x330   : > { %v1308_v30 = vpop.permute.xlu1 %1307 }
 0x34f   : > { %v1254_v12 = vpop.f32.mrf.mxu1 }
 0x355   : > { %v1283_v43 = vpop.f32.mrf.mxu3 }
 0x356   : > { %v1284_v39 = vadd.f32 %v1283_v43, %v1254_v12 }
 0x357   : > { %v1257_v4 = vpop.f32.mrf.mxu1 }
 0x358   : > { %v1315_v56 = vmul.f32 %v1298_v54, %v1284_v39 }
 0x35a   : > { %v1319_v63 = vadd.f32 %v1315_v56, %v1089_v14 }
 0x35c   : > { %v1323_v61 = vsel %vm730_vm4, %v1319_v63, -inf }
 0x35d   : > { %v1286_v9 = vpop.f32.mrf.mxu3  ;;  %1324 = vmax.xlane.f32.xlu1 %v1323_v61 }
 0x35e   : > { %v1287_v44 = vadd.f32 %v1286_v9, %v1257_v4 }
 0x35f   : > { %v1260_v41 = vpop.f32.mrf.mxu1 }
 0x360   : > { %v1316_v0 = vmul.f32 %v1303_v11, %v1287_v44 }
 0x362   : > { %v1320_v28 = vadd.f32 %v1316_v0, %v1090_v17 }
 0x364   : > { %v1326_v13 = vsel %vm730_vm4, %v1320_v28, -inf }
 0x365   : > { %v1289_v8 = vpop.f32.mrf.mxu3  ;;  %1327 = vmax.xlane.f32.xlu2 %v1326_v13 }
 0x366   : > { %v1290_v59 = vadd.f32 %v1289_v8, %v1260_v41 }
 0x367   : > { %v1263_v52 = vpop.f32.mrf.mxu1 }
 0x368   : > { %v1317_v32 = vmul.f32 %v1308_v30, %v1290_v59 }
 0x36a   : > { %v1321_v42 = vadd.f32 %v1317_v32, %v1091_v19 }
 0x36c   : > { %v1329_v29 = vsel %vm730_vm4, %v1321_v42, -inf }
 0x36d   : > { %v1292_v58 = vpop.f32.mrf.mxu3  ;;  %1330 = vmax.xlane.f32.xlu0 %v1329_v29 }
 0x36e   : > { %v1293_v62 = vadd.f32 %v1292_v58, %v1263_v52 }
 0x370   : > { %v1318_v23 = vmul.f32 %v1313_v3, %v1293_v62 }
 0x372   : > { %v1322_v26 = vadd.f32 %v1318_v23, %v1092_v48 }
 0x374   : > { %v1332_v27 = vsel %vm730_vm4, %v1322_v26, -inf }
 0x375   : > { %1333 = vmax.xlane.f32.xlu1 %v1332_v27 }
 0x3d0   : > { %v1325_v1 = vpop.xlane.xlu1 %1324 }
 0x3d1   : > { %v1335_v46 = vsub.f32 %v1319_v63, %v1325_v1 }
 0x3d3   : > { %v1339_v55 = vmul.f32 1.442695, %v1335_v46 }
 0x3d5   : > { %1889 = vpow2.f32 %v1339_v55 }
 0x3d8   : > { %v1328_v47 = vpop.xlane.xlu2 %1327 }
 0x3d9   : > { %v1336_v40 = vsub.f32 %v1320_v28, %v1328_v47 }
 0x3db   : > { %v1890_v49 = vpop.eup %1889  ;;  %v1341_v2 = vmul.f32 1.442695, %v1336_v40 }
 0x3dc   : > { %v1347_v31 = vsel %vm730_vm4, %v1890_v49, 0.0 }
 0x3dd   : > { %1891 = vpow2.f32 %v1341_v2  ;;  %1348 = vadd.xlane.f32.xlu2 %v1347_v31 }
 0x3e0   : > { %v1331_v25 = vpop.xlane.xlu0 %1330 }
 0x3e1   : > { %v1337_v5 = vsub.f32 %v1321_v42, %v1331_v25 }
 0x3e3   : > { %v2964_v57 = vpop.eup %1891  ;;  %v1343_v20 = vmul.f32 1.442695, %v1337_v5 }
 0x3e4   : > { %v1350_v7 = vsel %vm730_vm4, %v2964_v57, 0.0 }
 0x3e5   : > { %1893 = vpow2.f32 %v1343_v20  ;;  %1351 = vadd.xlane.f32.xlu1 %v1350_v7 }
 0x3e8   : > { %v1334_v21 = vpop.xlane.xlu1 %1333 }
 0x3e9   : > { %v1338_v24 = vsub.f32 %v1322_v26, %v1334_v21 }
 0x3eb   : > { %v2968_v15 = vpop.eup %1893  ;;  %v1345_v51 = vmul.f32 1.442695, %v1338_v24 }
 0x3ec   : > { %v1353_v45 = vsel %vm730_vm4, %v2968_v15, 0.0 }
 0x3ed   : > { %1895 = vpow2.f32 %v1345_v51  ;;  %1354 = vadd.xlane.f32.xlu2 %v1353_v45  ;;  %v1490_v45 = vld [vmem:[#allocation8 + $0x8] sm:$0xff] }
 0x3f3   : > { %v2972_v18 = vpop.eup %1895 }
 0x3f4   : > { %v1356_v38 = vsel %vm730_vm4, %v2972_v18, 0.0 }
 0x3f5   : > { %1357 = vadd.xlane.f32.xlu0 %v1356_v38  ;;  %v1492_v38 = vld [vmem:[#allocation8 + $0x18] sm:$0xff] }
 0x3fe   : > { %1499 = vperm.xlu1 %1870, %v1493_v60  }
 0x405   : > { %1504 = vperm.xlu2 %1868, %v1494_v10  }
 0x406   : > { %1514 = vperm.xlu1 %1870, %v1496_v35  }
 0x409   : > { %1509 = vperm.xlu0 %1869, %v1495_v33  }
 0x450   : > { %v1349_v22 = vpop.xlane.xlu2 %1348 }
 0x451   : > { %1897 = vrcp.f32 %v1349_v22  ;;  %v1370_v36 = vand.u32 2147483648, %v1349_v22  ;;  %v1368_v34 = vand.u32 2147483647, %v1349_v22  ;;  %vm1364_vm3 = vweird.f32 %v1349_v22 }
 0x453   : > { %v1371_v39 = vor.u32 1.1754944e-38, %v1370_v36  ;;  %vm1369_vm6 = vcmp.eq.f32.partialorder %v1368_v34, 8.507059e+37 }
 0x457   : > { %v1898_v50 = vpop.eup %1897 }
 0x458   : > { %v1360_v6 = vmul.f32 %v1898_v50, %v1349_v22  ;;  %v1352_v16 = vpop.xlane.xlu1 %1351  ;;  %vm1365_vm2 = vweird.f32 %v1898_v50 }
 0x459   : > { %1899 = vrcp.f32 %v1352_v16  ;;  %vm1366_vm5 = vmor %vm1364_vm3, %vm1365_vm2  ;;  %v1384_v9 = vand.u32 2147483648, %v1352_v16  ;;  %v1382_v44 = vand.u32 2147483647, %v1352_v16  ;;  %vm1378_vm8 = vweird.f32 %v1352_v16 }
 0x45a   : > { %v1361_v53 = vsub.f32 1.0, %v1360_v6 }
 0x45b   : > { %v1385_v28 = vor.u32 1.1754944e-38, %v1384_v9  ;;  %vm1383_vm10 = vcmp.eq.f32.partialorder %v1382_v44, 8.507059e+37 }
 0x45c   : > { %v1362_v37 = vmul.f32 %v1898_v50, %v1361_v53 }
 0x45e   : > { %v1363_v12 = vadd.f32 %v1898_v50, %v1362_v37 }
 0x45f   : > { %v1900_v43 = vpop.eup %1899 }
 0x460   : > { %v1367_v54 = vsel %vm1366_vm5, %v1898_v50, %v1363_v12  ;;  %v1374_v14 = vmul.f32 %v1900_v43, %v1352_v16  ;;  %v1355_v56 = vpop.xlane.xlu2 %1354  ;;  %vm1379_vm7 = vweird.f32 %v1900_v43 }
 0x461   : > { %v1372_v4 = vsel %vm1369_vm6, %v1371_v39, %v1367_v54  ;;  %1901 = vrcp.f32 %v1355_v56  ;;  %vm1380_vm9 = vmor %vm1378_vm8, %vm1379_vm7  ;;  %v1398_v32 = vand.u32 2147483648, %v1355_v56  ;;  %v1396_v29 = vand.u32 2147483647, %v1355_v56 }
 0x462   : > { %v1375_v63 = vsub.f32 1.0, %v1374_v14  ;;  %v1415_v61 = vmul.f32 %v1890_v49, %v1372_v4  ;;  %vm1392_vm12 = vweird.f32 %v1355_v56 }
 0x463   : > { %v1399_v62 = vor.u32 1.1754944e-38, %v1398_v32  ;;  %vm1397_vm14 = vcmp.eq.f32.partialorder %v1396_v29, 8.507059e+37 }
 0x464   : > { %v1376_v11 = vmul.f32 %v1900_v43, %v1375_v63  ;;  %1752 = vmatmul.msk.f32.vlgmr.msra.gmra.mxu1 %vm730_vm4, %v1415_v61  ;;  %1756 = vmatmul.msk.f32.vlgmr.msra.gmra.mxu3 %vm730_vm4, %v1415_v61 }
 0x466   : > { %v1377_v17 = vadd.f32 %v1900_v43, %v1376_v11 }
 0x467   : > { %v1902_v0 = vpop.eup %1901 }
 0x468   : > { %v1388_v41 = vmul.f32 %v1902_v0, %v1355_v56  ;;  %v1358_v13 = vpop.xlane.xlu0 %1357  ;;  %v1381_v8 = vsel %vm1380_vm9, %v1900_v43, %v1377_v17  ;;  %vm1393_vm11 = vweird.f32 %v1902_v0  ;;  %v1505_v33 = vpop.permute.xlu2 %1504 }
 0x469   : > { %1903 = vrcp.f32 %v1358_v13  ;;  %v1386_v30 = vsel %vm1383_vm10, %v1385_v28, %v1381_v8  ;;  %vm1394_vm13 = vmor %vm1392_vm12, %vm1393_vm11  ;;  %v1412_v1 = vand.u32 2147483648, %v1358_v13  ;;  %v1410_v55 = vand.u32 2147483647, %v1358_v13 }
 0x46a   : > { %v1389_v59 = vsub.f32 1.0, %v1388_v41  ;;  %v1416_v19 = vmul.f32 %v2964_v57, %v1386_v30  ;;  %vm1406_vm0 = vweird.f32 %v1358_v13 }
 0x46b   : > { %v1413_v40 = vor.u32 1.1754944e-38, %v1412_v1  ;;  %vm1411_vm2 = vcmp.eq.f32.partialorder %v1410_v55, 8.507059e+37 }
 0x46c   : > { %v1390_v42 = vmul.f32 %v1902_v0, %v1389_v59  ;;  %1753 = vmatmul.msk.f32.gmra.mxu1 %vm730_vm4, %v1416_v19  ;;  %1757 = vmatmul.msk.f32.gmra.mxu3 %vm730_vm4, %v1416_v19 }
 0x46e   : > { %v1391_v52 = vadd.f32 %v1902_v0, %v1390_v42 }
 0x46f   : > { %v1904_v58 = vpop.eup %1903 }
 0x470   : > { %v1402_v3 = vmul.f32 %v1904_v58, %v1358_v13  ;;  %v1395_v48 = vsel %vm1394_vm13, %v1902_v0, %v1391_v52  ;;  %vm1407_vm15 = vweird.f32 %v1904_v58  ;;  %v1500_v60 = vpop.permute.xlu1 %1499 }
 0x471   : > { %v1400_v23 = vsel %vm1397_vm14, %v1399_v62, %v1395_v48  ;;  %vm1408_vm1 = vmor %vm1406_vm0, %vm1407_vm15 }
 0x472   : > { %v1403_v26 = vsub.f32 1.0, %v1402_v3  ;;  %v1417_v27 = vmul.f32 %v2968_v15, %v1400_v23  ;;  %v1489_v15 = vld [vmem:[#allocation8] sm:$0xff] }
 0x474   : > { %v1404_v46 = vmul.f32 %v1904_v58, %v1403_v26  ;;  %1754 = vmatmul.msk.f32.gmra.mxu1 %vm730_vm4, %v1417_v27  ;;  %1758 = vmatmul.msk.f32.gmra.mxu3 %vm730_vm4, %v1417_v27 }
 0x476   : > { %v1405_v47 = vadd.f32 %v1904_v58, %v1404_v46 }
 0x478   : > { %v1409_v49 = vsel %vm1408_vm1, %v1904_v58, %v1405_v47  ;;  %v1515_v43 = vpop.permute.xlu1 %1514 }
 0x479   : > { %v1414_v2 = vsel %vm1411_vm2, %v1413_v40, %v1409_v49 }
 0x47a   : > { %v1418_v31 = vmul.f32 %v2972_v18, %v1414_v2  ;;  %v1491_v18 = vld [vmem:[#allocation8 + $0x10] sm:$0xff] }
 0x47b   : > { %v1510_v53 = vpop.permute.xlu0 %1509 }
 0x47c   : > { %1755 = vmatmul.msk.f32.gmra.mxu1 %vm730_vm4, %v1418_v31  ;;  %1759 = vmatmul.msk.f32.gmra.mxu3 %vm730_vm4, %v1418_v31 }
 0x4e1   : > { %v1448_v25 = vpop.f32.mrf.mxu1 }
 0x4e7   : > { %v1477_v5 = vpop.f32.mrf.mxu3 }
 0x4e9   : > { %v1451_v57 = vpop.f32.mrf.mxu1 }
 0x4ef   : > { %v1480_v20 = vpop.f32.mrf.mxu3 }
 0x4f1   : > { %v1454_v7 = vpop.f32.mrf.mxu1 }
 0x4f7   : > { %v1483_v21 = vpop.f32.mrf.mxu3 }
 0x4f9   : > { %v1457_v24 = vpop.f32.mrf.mxu1 }
 0x4fa   : > { %1541 = vmatpush.msrb.mxu1 %v1457_v24 }
 0x4fc   : > { %1542 = vmatpush.msrb.mxu1 %v1454_v7 }
 0x4fe   : > { %1543 = vmatpush.msrb.mxu1 %v1451_v57 }
 0x4ff   : > { %v1486_v51 = vpop.f32.mrf.mxu3 }
 0x500   : > { %1544 = vmatpush.msrb.mxu1 %v1448_v25  ;;  %1570 = vmatpush.msrb.mxu3 %v1486_v51 }
 0x501   : > { %1760 = vmatmul.msk.f32.vlgmr.msrb.gmra.mxu1 %vm730_vm4, %v1489_v15 }
 0x502   : > { %1571 = vmatpush.msrb.mxu3 %v1483_v21 }
 0x504   : > { %1572 = vmatpush.msrb.mxu3 %v1480_v20 }
 0x506   : > { %1573 = vmatpush.msrb.mxu3 %v1477_v5 }
 0x507   : > { %1764 = vmatmul.msk.f32.vlgmr.msrb.gmra.mxu3 %vm730_vm4, %v1489_v15 }
 0x509   : > { %1761 = vmatmul.msk.f32.gmra.mxu1 %vm730_vm4, %v1490_v45 }
 0x50f   : > { %1765 = vmatmul.msk.f32.gmra.mxu3 %vm730_vm4, %v1490_v45 }
 0x511   : > { %1762 = vmatmul.msk.f32.gmra.mxu1 %vm730_vm4, %v1491_v18 }
 0x517   : > { %1766 = vmatmul.msk.f32.gmra.mxu3 %vm730_vm4, %v1491_v18 }
 0x519   : > { %1763 = vmatmul.msk.f32.gmra.mxu1 %vm730_vm4, %v1492_v38 }
 0x51f   : > { %1767 = vmatmul.msk.f32.gmra.mxu3 %vm730_vm4, %v1492_v38 }
 0x57e   : > { %v1546_v10 = vpop.f32.mrf.mxu1 }
 0x57f   : > { %v1547_v35 = vadd.f32 %v1546_v10, %v1500_v60 }
 0x581   : > { %1587 = vst [vmem:[%s3009_s23] sm:$0xff] %v1547_v35 }
 0x586   : > { %v1549_v22 = vpop.f32.mrf.mxu1 }
 0x587   : > { %v1550_v50 = vadd.f32 %v1549_v22, %v1505_v33 }
 0x589   : > { %1589 = vst [vmem:[%s3009_s23 + $0x10] sm:$0xff] %v1550_v50 }
 0x58a   : > { %v1575_v6 = vpop.f32.mrf.mxu3 }
 0x58b   : > { %v1576_v16 = vadd.f32 %v1575_v6, %v1500_v60 }
 0x58d   : > { %1588 = vst [vmem:[%s3009_s23 + $0x8] sm:$0xff] %v1576_v16 }
 0x58e   : > { %v1552_v36 = vpop.f32.mrf.mxu1 }
 0x58f   : > { %v1553_v37 = vadd.f32 %v1552_v36, %v1510_v53 }
 0x591   : > { %1591 = vst [vmem:[%s3009_s23 + $0x20] sm:$0xff] %v1553_v37 }
 0x592   : > { %v1578_v34 = vpop.f32.mrf.mxu3 }
 0x593   : > { %v1579_v12 = vadd.f32 %v1578_v34, %v1505_v33 }
 0x595   : > { %1590 = vst [vmem:[%s3009_s23 + $0x18] sm:$0xff] %v1579_v12 }
 0x596   : > { %v1555_v39 = vpop.f32.mrf.mxu1 }
 0x597   : > { %v1556_v54 = vadd.f32 %v1555_v39, %v1515_v43 }
 0x599   : > { %1593 = vst [vmem:[%s3009_s23 + $0x30] sm:$0xff] %v1556_v54 }
 0x59a   : > { %v1581_v14 = vpop.f32.mrf.mxu3 }
 0x59b   : > { %v1582_v56 = vadd.f32 %v1581_v14, %v1510_v53 }
 0x59d   : > { %1592 = vst [vmem:[%s3009_s23 + $0x28] sm:$0xff] %v1582_v56 }
 0x5a2   : > { %v1584_v4 = vpop.f32.mrf.mxu3 }
 0x5a3   : > { %v1585_v63 = vadd.f32 %v1584_v4, %v1515_v43 }
 0x5a5   : > { %1594 = vst [vmem:[%s3009_s23 + $0x38] sm:$0xff] %v1585_v63 }
 0x5a6   : > { %2052 = shalt.err (!%p2049_p10)
}
 0x5a7   : > { %s2119_s18 = smov 256  }
 0x5a8   : > { %1789 = dma.vmem_to_hbm [thread:$0]  (%p2250_p3), %s1609_s21, 1024, %s1611_s17, %s1596_s22, %s2119_s18, %s2119_s18, %s2112_s10  }
 0x5a9 PF: > { %s1625_s23 = sand.u32 1, %s2087_s27   ;;  %p3077_p12 = scmp.ge.s32.totalorder %s2099_s30, 2 }
 0x5aa   : > { %s1626_s25 = scalar_lea.sflag [#allocation4], %s1625_s23 }
 0x5ab   : > { %p1806_p13 = pnand %p3077_p12, %p2200_p6 }
 0x5ad   : > { %p1807_p0 = pneg %p1806_p13 }
 0x5af   : > { %2082 = dma.done.wait (%p1807_p0), %s1626_s25, 1024  }
 0x5b0   : > { %2084 = vsyncadd (%p1807_p0), %s1626_s25, 4294966272  ;;  %p23_p5 = scmp.ge.s32.totalorder %s2237_s24, 4   ;;  %s3078_s27 = smov %s2091_s28 }
 0x5b1   : > { %s3079_s28 = smov %s2095_s29  ;;  %s3080_s29 = smov %s2246_s26 }
 0x5b2   : > { %s3081_s30 = smov %s2237_s24  ;;  %25 = sbr.rel (!%p23_p5) target bundleno = 10 (0xa), region = 109 }
 0x5b7   :  { %1632 = vsyncpa [#allocation3], 1 }
 0x5b8   :  { %1634 = vsyncpa [#allocation3 + $0x1], 1 }
 0x5b9   :  { %1635 = vsyncpa [#allocation6], 1 }
 0x5ba   :  { %1636 = vsyncpa [#allocation9], 1 }
 0x5bb   :  { %1637 = vsyncpa [#allocation4], 1 }
 0x5bc   :  { %1639 = vsyncpa [#allocation4 + $0x1], 1 }

</bundles_post_ra>
